<compile_context>
chip_gen: v6e
topology: v6e:2x2x1
jax: 0.10.0
libtpu: 0.0.40
codegen_flags: <defaults>
</compile_context>

<pallas_src>
import functools

import jax
import jax.numpy as jnp
from jax import lax
from jax.experimental import pallas as pl
from jax.experimental.pallas import tpu as pltpu


# ---------------------------------------------------------------------------
# Fused kernel: one batch element per grid step.
# ---------------------------------------------------------------------------
def _dab_kernel(x_ref, mask_ref, w1_ref, b1_ref, w2_ref, b2_ref,
                wca1_ref, bca1_ref, wca2_ref, bca2_ref, o_ref, *, C, Cr, H, W):
    HW = H * W
    f32 = jnp.float32
    x = x_ref[0].astype(f32)                                    # (C, HW), lane-dense

    taps = [(dy, dx) for dy in (-1, 0, 1) for dx in (-1, 0, 1)]
    PAD = W + 1                                                 # halo for any 3x3 shift

    def shifted_taps(a):
        """Per-tap spatially-shifted copies of a (rows, HW) array, zero outside."""
        rows = a.shape[0]
        zp = jnp.zeros((rows, PAD), f32)
        ap = jnp.concatenate([zp, a, zp], axis=1)               # (rows, HW + 2*PAD)
        outs = []
        for t, (dy, dx) in enumerate(taps):
            d = dy * W + dx
            sl = ap[:, PAD + d:PAD + d + HW]                    # contiguous lane slice
            outs.append(sl * mask_ref[t])                       # (1, HW) mask broadcast
        return outs

    # ---- PALayer conv1: 3x3, C -> Cr  (single im2col MXU matmul, K = 9*C) ----
    patches = jnp.concatenate(shifted_taps(x), axis=0)          # (9*C, HW)
    h = jnp.dot(w1_ref[...].astype(f32), patches,
                preferred_element_type=f32)                     # (Cr, HW)
    h = jnp.maximum(h + b1_ref[...].astype(f32), 0.0)           # ReLU

    # ---- PALayer conv2: 3x3, Cr -> 1  (VPU multiply-add; avoid K=Cr/N=1 MXU) ----
    y = jnp.zeros((1, HW), f32)
    h_taps = shifted_taps(h)
    for t in range(9):
        wt = w2_ref[t * Cr:(t + 1) * Cr, :].astype(f32)         # (Cr, 1)
        y = y + jnp.sum(h_taps[t] * wt, axis=0, keepdims=True)  # (1, HW)
    gate = jax.nn.sigmoid(y + b2_ref[...].astype(f32))          # (1, HW)
    out_pa = x * gate                                           # pixel-attention gate

    # ---- CALayer: global avg-pool -> center-tap MLP -> sigmoid channel gate ----
    pooled = jnp.mean(out_pa, axis=1, keepdims=True)            # (C, 1)
    hca = jnp.maximum(
        jnp.dot(wca1_ref[...].astype(f32), pooled, preferred_element_type=f32)
        + bca1_ref[...].astype(f32), 0.0)                       # (Cr, 1)
    yca = jax.nn.sigmoid(
        jnp.dot(wca2_ref[...].astype(f32), hca, preferred_element_type=f32)
        + bca2_ref[...].astype(f32))                            # (C, 1)

    o_ref[0] = (out_pa * yca).astype(o_ref.dtype)               # unmasked 128-lane stores


# ---------------------------------------------------------------------------
# Wrapper
# ---------------------------------------------------------------------------
def deep_attention_block(x_nchw, params):
    """x_nchw: (N, C, H, W).  Params are PyTorch-layout OIHW conv weights."""
    N, C, H, W = x_nchw.shape
    Cr = params["wpa1"].shape[0]
    HW = H * W

    # --- one-time weight re-layout (tiny, done in XLA at trace time) ---
    # PA conv1 -> im2col matrix (Cr, 9*C), tap-major (tap t = (ky*3 + kx)).
    w1_mat = jnp.transpose(params["wpa1"], (0, 2, 3, 1)).reshape(Cr, 9 * C)
    b1 = params["bpa1"].reshape(Cr, 1)
    # PA conv2 -> per-tap column weights (9*Cr, 1), tap-major.
    w2_col = jnp.transpose(params["wpa2"][0], (1, 2, 0)).reshape(9 * Cr, 1)
    b2 = params["bpa2"].reshape(1, 1)
    # CA: zero-padded 3x3 conv on a 1x1 input == its center tap only.
    wca1_c = params["wca1"][:, :, 1, 1]                         # (Cr, C)
    bca1 = params["bca1"].reshape(Cr, 1)
    wca2_c = params["wca2"][:, :, 1, 1]                         # (C, Cr)
    bca2 = params["bca2"].reshape(C, 1)

    # Per-tap validity masks over the flattened spatial axis (shared by all N).
    row = jnp.arange(HW, dtype=jnp.int32) // W
    col = jnp.arange(HW, dtype=jnp.int32) % W
    taps = [(dy, dx) for dy in (-1, 0, 1) for dx in (-1, 0, 1)]
    masks = jnp.stack(
        [((row + dy >= 0) & (row + dy < H) &
          (col + dx >= 0) & (col + dx < W)).astype(jnp.float32)
         for dy, dx in taps], axis=0).reshape(9, 1, HW)

    xf = x_nchw.reshape(N, C, HW)                               # pure reshape, no copy

    kernel = functools.partial(_dab_kernel, C=C, Cr=Cr, H=H, W=W)
    out = pl.pallas_call(
        kernel,
        out_shape=jax.ShapeDtypeStruct((N, C, HW), x_nchw.dtype),
        grid=(N,),
        in_specs=[
            pl.BlockSpec((1, C, HW), lambda n: (n, 0, 0)),      # x (per-batch block)
            pl.BlockSpec((9, 1, HW), lambda n: (0, 0, 0)),      # tap masks
            pl.BlockSpec((Cr, 9 * C), lambda n: (0, 0)),        # PA conv1 (im2col)
            pl.BlockSpec((Cr, 1), lambda n: (0, 0)),            # PA conv1 bias
            pl.BlockSpec((9 * Cr, 1), lambda n: (0, 0)),        # PA conv2 weights
            pl.BlockSpec((1, 1), lambda n: (0, 0)),             # PA conv2 bias
            pl.BlockSpec((Cr, C), lambda n: (0, 0)),            # CA fc1 (center tap)
            pl.BlockSpec((Cr, 1), lambda n: (0, 0)),            # CA fc1 bias
            pl.BlockSpec((C, Cr), lambda n: (0, 0)),            # CA fc2 (center tap)
            pl.BlockSpec((C, 1), lambda n: (0, 0)),             # CA fc2 bias
        ],
        out_specs=pl.BlockSpec((1, C, HW), lambda n: (n, 0, 0)),
        input_output_aliases={0: 0},                            # in-place gating, no extra HBM stream
        compiler_params=pltpu.CompilerParams(
            dimension_semantics=("parallel",)),                 # batch across TCs (v7x megacore)
    )(xf, masks, w1_mat, b1, w2_col, b2, wca1_c, bca1, wca2_c, bca2)

    return out.reshape(N, C, H, W)


# ---------------------------------------------------------------------------
# Parameters (PyTorch OIHW layout) + pure-JAX reference
# ---------------------------------------------------------------------------
def init_params(key, channel):
    Cr = max(channel // 8, 1)
    ks = jax.random.split(key, 8)

    def conv_w(k, cout, cin):
        std = 1.0 / (3.0 * (cin ** 0.5))
        return jax.random.normal(k, (cout, cin, 3, 3), jnp.float32) * std

    def bias(k, c):
        return jax.random.normal(k, (c,), jnp.float32) * 0.1

    return dict(
        wpa1=conv_w(ks[0], Cr, channel), bpa1=bias(ks[1], Cr),
        wpa2=conv_w(ks[2], 1, Cr),       bpa2=bias(ks[3], 1),
        wca1=conv_w(ks[4], Cr, channel), bca1=bias(ks[5], Cr),
        wca2=conv_w(ks[6], channel, Cr), bca2=bias(ks[7], channel),
    )


def _ref_conv(x, w, b):
    out = lax.conv_general_dilated(
        x, w, (1, 1), "SAME", dimension_numbers=("NCHW", "OIHW", "NCHW"))
    return out + b.reshape(1, -1, 1, 1)


def deep_attention_block_reference(x, p):
    # PALayer
    h = jnp.maximum(_ref_conv(x, p["wpa1"], p["bpa1"]), 0.0)
    out = x * jax.nn.sigmoid(_ref_conv(h, p["wpa2"], p["bpa2"]))
    # CALayer
    pooled = jnp.mean(out, axis=(2, 3), keepdims=True)
    hca = jnp.maximum(_ref_conv(pooled, p["wca1"], p["bca1"]), 0.0)
    yca = jax.nn.sigmoid(_ref_conv(hca, p["wca2"], p["bca2"]))
    return out * yca


# ---------------------------------------------------------------------------
if __name__ == "__main__":
    N, C, H, W = 2, 16, 16, 16          # channel must be >= 8 so channel//8 >= 1
    key = jax.random.PRNGKey(0)
    kx, kp = jax.random.split(key)
    x = jax.random.normal(kx, (N, C, H, W), jnp.float32)   # PyTorch NCHW input
    params = init_params(kp, C)

    out = jax.block_until_ready(jax.jit(deep_attention_block)(x, params))
    assert out.shape == (N, C, H, W)

    ref = jax.block_until_ready(deep_attention_block_reference(x, params))
    max_err = float(jnp.max(jnp.abs(out - ref)))
    assert max_err < 1e-3, f"mismatch vs reference: {max_err}"

    print("KERNEL_OK")
</pallas_src>

<mosaic_0001>
module attributes {stable_mosaic.version = 11 : i64} {
  func.func @_dab_kernel(%arg0: i32, %arg1: memref<1x16x256xf32, #tpu.memory_space<vmem>>, %arg2: memref<9x1x256xf32, #tpu.memory_space<vmem>>, %arg3: memref<2x144xf32, #tpu.memory_space<vmem>>, %arg4: memref<2x1xf32, #tpu.memory_space<vmem>>, %arg5: memref<18x1xf32, #tpu.memory_space<vmem>>, %arg6: memref<1x1xf32, #tpu.memory_space<vmem>>, %arg7: memref<2x16xf32, #tpu.memory_space<vmem>>, %arg8: memref<2x1xf32, #tpu.memory_space<vmem>>, %arg9: memref<16x2xf32, #tpu.memory_space<vmem>>, %arg10: memref<16x1xf32, #tpu.memory_space<vmem>>, %arg11: memref<1x16x256xf32, #tpu.memory_space<vmem>>) attributes {dimension_semantics = [#tpu.dimension_semantics<parallel>], iteration_bounds = array<i64: 2>, scalar_prefetch = 0 : i64, scratch_operands = 0 : i64, tpu.core_type = #tpu.core_type<tc>, window_params = [{transform_indices = @transform_0, window_bounds = array<i64: 1, 16, 256>}, {pipeline_mode = #tpu.pipeline_mode<synchronous>, transform_indices = @transform_1, window_bounds = array<i64: 9, 1, 256>}, {pipeline_mode = #tpu.pipeline_mode<synchronous>, transform_indices = @transform_2, window_bounds = array<i64: 2, 144>}, {pipeline_mode = #tpu.pipeline_mode<synchronous>, transform_indices = @transform_3, window_bounds = array<i64: 2, 1>}, {pipeline_mode = #tpu.pipeline_mode<synchronous>, transform_indices = @transform_4, window_bounds = array<i64: 18, 1>}, {pipeline_mode = #tpu.pipeline_mode<synchronous>, transform_indices = @transform_5, window_bounds = array<i64: 1, 1>}, {pipeline_mode = #tpu.pipeline_mode<synchronous>, transform_indices = @transform_6, window_bounds = array<i64: 2, 16>}, {pipeline_mode = #tpu.pipeline_mode<synchronous>, transform_indices = @transform_7, window_bounds = array<i64: 2, 1>}, {pipeline_mode = #tpu.pipeline_mode<synchronous>, transform_indices = @transform_8, window_bounds = array<i64: 16, 2>}, {pipeline_mode = #tpu.pipeline_mode<synchronous>, transform_indices = @transform_9, window_bounds = array<i64: 16, 1>}, {transform_indices = @transform_10, window_bounds = array<i64: 1, 16, 256>}]} {
    %c0 = arith.constant 0 : index
    %c0_0 = arith.constant 0 : index
    %c0_1 = arith.constant 0 : index
    %0 = vector.load %arg1[%c0, %c0_0, %c0_1] : memref<1x16x256xf32, #tpu.memory_space<vmem>>, vector<1x16x256xf32>
    %1 = vector.shape_cast %0 : vector<1x16x256xf32> to vector<16x256xf32>
    %cst = arith.constant 0.000000e+00 : f32
    %2 = vector.broadcast %cst : f32 to vector<16x17xf32>
    %3 = tpu.concatenate %2, %1, %2 in 1 : vector<16x17xf32>, vector<16x256xf32>, vector<16x17xf32> -> vector<16x290xf32>
    %4 = vector.extract_strided_slice %3 {offsets = [0, 0], sizes = [16, 256], strides = [1, 1]} : vector<16x290xf32> to vector<16x256xf32>
    %c0_2 = arith.constant 0 : index
    %c0_3 = arith.constant 0 : index
    %c0_4 = arith.constant 0 : index
    %5 = vector.load %arg2[%c0_2, %c0_3, %c0_4] : memref<9x1x256xf32, #tpu.memory_space<vmem>>, vector<1x1x256xf32>
    %6 = vector.shape_cast %5 : vector<1x1x256xf32> to vector<1x256xf32>
    %7 = vector.broadcast %6 : vector<1x256xf32> to vector<16x256xf32>
    %8 = arith.mulf %4, %7 : vector<16x256xf32>
    %9 = vector.extract_strided_slice %3 {offsets = [0, 1], sizes = [16, 256], strides = [1, 1]} : vector<16x290xf32> to vector<16x256xf32>
    %c1 = arith.constant 1 : index
    %c0_5 = arith.constant 0 : index
    %c0_6 = arith.constant 0 : index
    %10 = vector.load %arg2[%c1, %c0_5, %c0_6] : memref<9x1x256xf32, #tpu.memory_space<vmem>>, vector<1x1x256xf32>
    %11 = vector.shape_cast %10 : vector<1x1x256xf32> to vector<1x256xf32>
    %12 = vector.broadcast %11 : vector<1x256xf32> to vector<16x256xf32>
    %13 = arith.mulf %9, %12 : vector<16x256xf32>
    %14 = vector.extract_strided_slice %3 {offsets = [0, 2], sizes = [16, 256], strides = [1, 1]} : vector<16x290xf32> to vector<16x256xf32>
    %c2 = arith.constant 2 : index
    %c0_7 = arith.constant 0 : index
    %c0_8 = arith.constant 0 : index
    %15 = vector.load %arg2[%c2, %c0_7, %c0_8] : memref<9x1x256xf32, #tpu.memory_space<vmem>>, vector<1x1x256xf32>
    %16 = vector.shape_cast %15 : vector<1x1x256xf32> to vector<1x256xf32>
    %17 = vector.broadcast %16 : vector<1x256xf32> to vector<16x256xf32>
    %18 = arith.mulf %14, %17 : vector<16x256xf32>
    %19 = vector.extract_strided_slice %3 {offsets = [0, 16], sizes = [16, 256], strides = [1, 1]} : vector<16x290xf32> to vector<16x256xf32>
    %c3 = arith.constant 3 : index
    %c0_9 = arith.constant 0 : index
    %c0_10 = arith.constant 0 : index
    %20 = vector.load %arg2[%c3, %c0_9, %c0_10] : memref<9x1x256xf32, #tpu.memory_space<vmem>>, vector<1x1x256xf32>
    %21 = vector.shape_cast %20 : vector<1x1x256xf32> to vector<1x256xf32>
    %22 = vector.broadcast %21 : vector<1x256xf32> to vector<16x256xf32>
    %23 = arith.mulf %19, %22 : vector<16x256xf32>
    %24 = vector.extract_strided_slice %3 {offsets = [0, 17], sizes = [16, 256], strides = [1, 1]} : vector<16x290xf32> to vector<16x256xf32>
    %c4 = arith.constant 4 : index
    %c0_11 = arith.constant 0 : index
    %c0_12 = arith.constant 0 : index
    %25 = vector.load %arg2[%c4, %c0_11, %c0_12] : memref<9x1x256xf32, #tpu.memory_space<vmem>>, vector<1x1x256xf32>
    %26 = vector.shape_cast %25 : vector<1x1x256xf32> to vector<1x256xf32>
    %27 = vector.broadcast %26 : vector<1x256xf32> to vector<16x256xf32>
    %28 = arith.mulf %24, %27 : vector<16x256xf32>
    %29 = vector.extract_strided_slice %3 {offsets = [0, 18], sizes = [16, 256], strides = [1, 1]} : vector<16x290xf32> to vector<16x256xf32>
    %c5 = arith.constant 5 : index
    %c0_13 = arith.constant 0 : index
    %c0_14 = arith.constant 0 : index
    %30 = vector.load %arg2[%c5, %c0_13, %c0_14] : memref<9x1x256xf32, #tpu.memory_space<vmem>>, vector<1x1x256xf32>
    %31 = vector.shape_cast %30 : vector<1x1x256xf32> to vector<1x256xf32>
    %32 = vector.broadcast %31 : vector<1x256xf32> to vector<16x256xf32>
    %33 = arith.mulf %29, %32 : vector<16x256xf32>
    %34 = vector.extract_strided_slice %3 {offsets = [0, 32], sizes = [16, 256], strides = [1, 1]} : vector<16x290xf32> to vector<16x256xf32>
    %c6 = arith.constant 6 : index
    %c0_15 = arith.constant 0 : index
    %c0_16 = arith.constant 0 : index
    %35 = vector.load %arg2[%c6, %c0_15, %c0_16] : memref<9x1x256xf32, #tpu.memory_space<vmem>>, vector<1x1x256xf32>
    %36 = vector.shape_cast %35 : vector<1x1x256xf32> to vector<1x256xf32>
    %37 = vector.broadcast %36 : vector<1x256xf32> to vector<16x256xf32>
    %38 = arith.mulf %34, %37 : vector<16x256xf32>
    %39 = vector.extract_strided_slice %3 {offsets = [0, 33], sizes = [16, 256], strides = [1, 1]} : vector<16x290xf32> to vector<16x256xf32>
    %c7 = arith.constant 7 : index
    %c0_17 = arith.constant 0 : index
    %c0_18 = arith.constant 0 : index
    %40 = vector.load %arg2[%c7, %c0_17, %c0_18] : memref<9x1x256xf32, #tpu.memory_space<vmem>>, vector<1x1x256xf32>
    %41 = vector.shape_cast %40 : vector<1x1x256xf32> to vector<1x256xf32>
    %42 = vector.broadcast %41 : vector<1x256xf32> to vector<16x256xf32>
    %43 = arith.mulf %39, %42 : vector<16x256xf32>
    %44 = vector.extract_strided_slice %3 {offsets = [0, 34], sizes = [16, 256], strides = [1, 1]} : vector<16x290xf32> to vector<16x256xf32>
    %c8 = arith.constant 8 : index
    %c0_19 = arith.constant 0 : index
    %c0_20 = arith.constant 0 : index
    %45 = vector.load %arg2[%c8, %c0_19, %c0_20] : memref<9x1x256xf32, #tpu.memory_space<vmem>>, vector<1x1x256xf32>
    %46 = vector.shape_cast %45 : vector<1x1x256xf32> to vector<1x256xf32>
    %47 = vector.broadcast %46 : vector<1x256xf32> to vector<16x256xf32>
    %48 = arith.mulf %44, %47 : vector<16x256xf32>
    %49 = tpu.concatenate %8, %13, %18, %23, %28, %33, %38, %43, %48 in 0 : vector<16x256xf32>, vector<16x256xf32>, vector<16x256xf32>, vector<16x256xf32>, vector<16x256xf32>, vector<16x256xf32>, vector<16x256xf32>, vector<16x256xf32>, vector<16x256xf32> -> vector<144x256xf32>
    %c0_21 = arith.constant 0 : index
    %c0_22 = arith.constant 0 : index
    %50 = vector.load %arg3[%c0_21, %c0_22] : memref<2x144xf32, #tpu.memory_space<vmem>>, vector<2x144xf32>
    %cst_23 = arith.constant dense<0.000000e+00> : vector<2x256xf32>
    %51 = tpu.matmul %50, %49, %cst_23 {dimension_numbers = #tpu.dot_dimension_numbers<[1], [0], [0], [1], [0, 0, 1, 1], [], []>} : vector<2x144xf32>, vector<144x256xf32>, vector<2x256xf32> -> vector<2x256xf32>
    %c0_24 = arith.constant 0 : index
    %c0_25 = arith.constant 0 : index
    %52 = vector.load %arg4[%c0_24, %c0_25] : memref<2x1xf32, #tpu.memory_space<vmem>>, vector<2x1xf32>
    %53 = vector.broadcast %52 : vector<2x1xf32> to vector<2x256xf32>
    %54 = arith.addf %51, %53 : vector<2x256xf32>
    %cst_26 = arith.constant 0.000000e+00 : f32
    %55 = vector.broadcast %cst_26 : f32 to vector<2x256xf32>
    %56 = arith.maximumf %54, %55 : vector<2x256xf32>
    %cst_27 = arith.constant 0.000000e+00 : f32
    %57 = vector.broadcast %cst_27 : f32 to vector<1x256xf32>
    %cst_28 = arith.constant 0.000000e+00 : f32
    %58 = vector.broadcast %cst_28 : f32 to vector<2x17xf32>
    %59 = tpu.concatenate %58, %56, %58 in 1 : vector<2x17xf32>, vector<2x256xf32>, vector<2x17xf32> -> vector<2x290xf32>
    %60 = vector.extract_strided_slice %59 {offsets = [0, 0], sizes = [2, 256], strides = [1, 1]} : vector<2x290xf32> to vector<2x256xf32>
    %c0_29 = arith.constant 0 : index
    %c0_30 = arith.constant 0 : index
    %c0_31 = arith.constant 0 : index
    %61 = vector.load %arg2[%c0_29, %c0_30, %c0_31] : memref<9x1x256xf32, #tpu.memory_space<vmem>>, vector<1x1x256xf32>
    %62 = vector.shape_cast %61 : vector<1x1x256xf32> to vector<1x256xf32>
    %63 = vector.broadcast %62 : vector<1x256xf32> to vector<2x256xf32>
    %64 = arith.mulf %60, %63 : vector<2x256xf32>
    %65 = vector.extract_strided_slice %59 {offsets = [0, 1], sizes = [2, 256], strides = [1, 1]} : vector<2x290xf32> to vector<2x256xf32>
    %c1_32 = arith.constant 1 : index
    %c0_33 = arith.constant 0 : index
    %c0_34 = arith.constant 0 : index
    %66 = vector.load %arg2[%c1_32, %c0_33, %c0_34] : memref<9x1x256xf32, #tpu.memory_space<vmem>>, vector<1x1x256xf32>
    %67 = vector.shape_cast %66 : vector<1x1x256xf32> to vector<1x256xf32>
    %68 = vector.broadcast %67 : vector<1x256xf32> to vector<2x256xf32>
    %69 = arith.mulf %65, %68 : vector<2x256xf32>
    %70 = vector.extract_strided_slice %59 {offsets = [0, 2], sizes = [2, 256], strides = [1, 1]} : vector<2x290xf32> to vector<2x256xf32>
    %c2_35 = arith.constant 2 : index
    %c0_36 = arith.constant 0 : index
    %c0_37 = arith.constant 0 : index
    %71 = vector.load %arg2[%c2_35, %c0_36, %c0_37] : memref<9x1x256xf32, #tpu.memory_space<vmem>>, vector<1x1x256xf32>
    %72 = vector.shape_cast %71 : vector<1x1x256xf32> to vector<1x256xf32>
    %73 = vector.broadcast %72 : vector<1x256xf32> to vector<2x256xf32>
    %74 = arith.mulf %70, %73 : vector<2x256xf32>
    %75 = vector.extract_strided_slice %59 {offsets = [0, 16], sizes = [2, 256], strides = [1, 1]} : vector<2x290xf32> to vector<2x256xf32>
    %c3_38 = arith.constant 3 : index
    %c0_39 = arith.constant 0 : index
    %c0_40 = arith.constant 0 : index
    %76 = vector.load %arg2[%c3_38, %c0_39, %c0_40] : memref<9x1x256xf32, #tpu.memory_space<vmem>>, vector<1x1x256xf32>
    %77 = vector.shape_cast %76 : vector<1x1x256xf32> to vector<1x256xf32>
    %78 = vector.broadcast %77 : vector<1x256xf32> to vector<2x256xf32>
    %79 = arith.mulf %75, %78 : vector<2x256xf32>
    %80 = vector.extract_strided_slice %59 {offsets = [0, 17], sizes = [2, 256], strides = [1, 1]} : vector<2x290xf32> to vector<2x256xf32>
    %c4_41 = arith.constant 4 : index
    %c0_42 = arith.constant 0 : index
    %c0_43 = arith.constant 0 : index
    %81 = vector.load %arg2[%c4_41, %c0_42, %c0_43] : memref<9x1x256xf32, #tpu.memory_space<vmem>>, vector<1x1x256xf32>
    %82 = vector.shape_cast %81 : vector<1x1x256xf32> to vector<1x256xf32>
    %83 = vector.broadcast %82 : vector<1x256xf32> to vector<2x256xf32>
    %84 = arith.mulf %80, %83 : vector<2x256xf32>
    %85 = vector.extract_strided_slice %59 {offsets = [0, 18], sizes = [2, 256], strides = [1, 1]} : vector<2x290xf32> to vector<2x256xf32>
    %c5_44 = arith.constant 5 : index
    %c0_45 = arith.constant 0 : index
    %c0_46 = arith.constant 0 : index
    %86 = vector.load %arg2[%c5_44, %c0_45, %c0_46] : memref<9x1x256xf32, #tpu.memory_space<vmem>>, vector<1x1x256xf32>
    %87 = vector.shape_cast %86 : vector<1x1x256xf32> to vector<1x256xf32>
    %88 = vector.broadcast %87 : vector<1x256xf32> to vector<2x256xf32>
    %89 = arith.mulf %85, %88 : vector<2x256xf32>
    %90 = vector.extract_strided_slice %59 {offsets = [0, 32], sizes = [2, 256], strides = [1, 1]} : vector<2x290xf32> to vector<2x256xf32>
    %c6_47 = arith.constant 6 : index
    %c0_48 = arith.constant 0 : index
    %c0_49 = arith.constant 0 : index
    %91 = vector.load %arg2[%c6_47, %c0_48, %c0_49] : memref<9x1x256xf32, #tpu.memory_space<vmem>>, vector<1x1x256xf32>
    %92 = vector.shape_cast %91 : vector<1x1x256xf32> to vector<1x256xf32>
    %93 = vector.broadcast %92 : vector<1x256xf32> to vector<2x256xf32>
    %94 = arith.mulf %90, %93 : vector<2x256xf32>
    %95 = vector.extract_strided_slice %59 {offsets = [0, 33], sizes = [2, 256], strides = [1, 1]} : vector<2x290xf32> to vector<2x256xf32>
    %c7_50 = arith.constant 7 : index
    %c0_51 = arith.constant 0 : index
    %c0_52 = arith.constant 0 : index
    %96 = vector.load %arg2[%c7_50, %c0_51, %c0_52] : memref<9x1x256xf32, #tpu.memory_space<vmem>>, vector<1x1x256xf32>
    %97 = vector.shape_cast %96 : vector<1x1x256xf32> to vector<1x256xf32>
    %98 = vector.broadcast %97 : vector<1x256xf32> to vector<2x256xf32>
    %99 = arith.mulf %95, %98 : vector<2x256xf32>
    %100 = vector.extract_strided_slice %59 {offsets = [0, 34], sizes = [2, 256], strides = [1, 1]} : vector<2x290xf32> to vector<2x256xf32>
    %c8_53 = arith.constant 8 : index
    %c0_54 = arith.constant 0 : index
    %c0_55 = arith.constant 0 : index
    %101 = vector.load %arg2[%c8_53, %c0_54, %c0_55] : memref<9x1x256xf32, #tpu.memory_space<vmem>>, vector<1x1x256xf32>
    %102 = vector.shape_cast %101 : vector<1x1x256xf32> to vector<1x256xf32>
    %103 = vector.broadcast %102 : vector<1x256xf32> to vector<2x256xf32>
    %104 = arith.mulf %100, %103 : vector<2x256xf32>
    %c0_56 = arith.constant 0 : index
    %c0_57 = arith.constant 0 : index
    %105 = vector.load %arg5[%c0_56, %c0_57] : memref<18x1xf32, #tpu.memory_space<vmem>>, vector<2x1xf32>
    %106 = vector.broadcast %105 : vector<2x1xf32> to vector<2x256xf32>
    %107 = arith.mulf %64, %106 : vector<2x256xf32>
    %cst_58 = arith.constant dense<0.000000e+00> : vector<256xf32>
    %108 = vector.multi_reduction <add>, %107, %cst_58 [0] : vector<2x256xf32> to vector<256xf32>
    %109 = vector.shape_cast %108 : vector<256xf32> to vector<1x256xf32>
    %110 = arith.addf %57, %109 : vector<1x256xf32>
    %c2_59 = arith.constant 2 : index
    %c0_60 = arith.constant 0 : index
    %111 = vector.load %arg5[%c2_59, %c0_60] : memref<18x1xf32, #tpu.memory_space<vmem>>, vector<2x1xf32>
    %112 = vector.broadcast %111 : vector<2x1xf32> to vector<2x256xf32>
    %113 = arith.mulf %69, %112 : vector<2x256xf32>
    %cst_61 = arith.constant dense<0.000000e+00> : vector<256xf32>
    %114 = vector.multi_reduction <add>, %113, %cst_61 [0] : vector<2x256xf32> to vector<256xf32>
    %115 = vector.shape_cast %114 : vector<256xf32> to vector<1x256xf32>
    %116 = arith.addf %110, %115 : vector<1x256xf32>
    %c4_62 = arith.constant 4 : index
    %c0_63 = arith.constant 0 : index
    %117 = vector.load %arg5[%c4_62, %c0_63] : memref<18x1xf32, #tpu.memory_space<vmem>>, vector<2x1xf32>
    %118 = vector.broadcast %117 : vector<2x1xf32> to vector<2x256xf32>
    %119 = arith.mulf %74, %118 : vector<2x256xf32>
    %cst_64 = arith.constant dense<0.000000e+00> : vector<256xf32>
    %120 = vector.multi_reduction <add>, %119, %cst_64 [0] : vector<2x256xf32> to vector<256xf32>
    %121 = vector.shape_cast %120 : vector<256xf32> to vector<1x256xf32>
    %122 = arith.addf %116, %121 : vector<1x256xf32>
    %c6_65 = arith.constant 6 : index
    %c0_66 = arith.constant 0 : index
    %123 = vector.load %arg5[%c6_65, %c0_66] : memref<18x1xf32, #tpu.memory_space<vmem>>, vector<2x1xf32>
    %124 = vector.broadcast %123 : vector<2x1xf32> to vector<2x256xf32>
    %125 = arith.mulf %79, %124 : vector<2x256xf32>
    %cst_67 = arith.constant dense<0.000000e+00> : vector<256xf32>
    %126 = vector.multi_reduction <add>, %125, %cst_67 [0] : vector<2x256xf32> to vector<256xf32>
    %127 = vector.shape_cast %126 : vector<256xf32> to vector<1x256xf32>
    %128 = arith.addf %122, %127 : vector<1x256xf32>
    %c8_68 = arith.constant 8 : index
    %c0_69 = arith.constant 0 : index
    %129 = vector.load %arg5[%c8_68, %c0_69] : memref<18x1xf32, #tpu.memory_space<vmem>>, vector<2x1xf32>
    %130 = vector.broadcast %129 : vector<2x1xf32> to vector<2x256xf32>
    %131 = arith.mulf %84, %130 : vector<2x256xf32>
    %cst_70 = arith.constant dense<0.000000e+00> : vector<256xf32>
    %132 = vector.multi_reduction <add>, %131, %cst_70 [0] : vector<2x256xf32> to vector<256xf32>
    %133 = vector.shape_cast %132 : vector<256xf32> to vector<1x256xf32>
    %134 = arith.addf %128, %133 : vector<1x256xf32>
    %c10 = arith.constant 10 : index
    %c0_71 = arith.constant 0 : index
    %135 = vector.load %arg5[%c10, %c0_71] : memref<18x1xf32, #tpu.memory_space<vmem>>, vector<2x1xf32>
    %136 = vector.broadcast %135 : vector<2x1xf32> to vector<2x256xf32>
    %137 = arith.mulf %89, %136 : vector<2x256xf32>
    %cst_72 = arith.constant dense<0.000000e+00> : vector<256xf32>
    %138 = vector.multi_reduction <add>, %137, %cst_72 [0] : vector<2x256xf32> to vector<256xf32>
    %139 = vector.shape_cast %138 : vector<256xf32> to vector<1x256xf32>
    %140 = arith.addf %134, %139 : vector<1x256xf32>
    %c12 = arith.constant 12 : index
    %c0_73 = arith.constant 0 : index
    %141 = vector.load %arg5[%c12, %c0_73] : memref<18x1xf32, #tpu.memory_space<vmem>>, vector<2x1xf32>
    %142 = vector.broadcast %141 : vector<2x1xf32> to vector<2x256xf32>
    %143 = arith.mulf %94, %142 : vector<2x256xf32>
    %cst_74 = arith.constant dense<0.000000e+00> : vector<256xf32>
    %144 = vector.multi_reduction <add>, %143, %cst_74 [0] : vector<2x256xf32> to vector<256xf32>
    %145 = vector.shape_cast %144 : vector<256xf32> to vector<1x256xf32>
    %146 = arith.addf %140, %145 : vector<1x256xf32>
    %c14 = arith.constant 14 : index
    %c0_75 = arith.constant 0 : index
    %147 = vector.load %arg5[%c14, %c0_75] : memref<18x1xf32, #tpu.memory_space<vmem>>, vector<2x1xf32>
    %148 = vector.broadcast %147 : vector<2x1xf32> to vector<2x256xf32>
    %149 = arith.mulf %99, %148 : vector<2x256xf32>
    %cst_76 = arith.constant dense<0.000000e+00> : vector<256xf32>
    %150 = vector.multi_reduction <add>, %149, %cst_76 [0] : vector<2x256xf32> to vector<256xf32>
    %151 = vector.shape_cast %150 : vector<256xf32> to vector<1x256xf32>
    %152 = arith.addf %146, %151 : vector<1x256xf32>
    %c16 = arith.constant 16 : index
    %c0_77 = arith.constant 0 : index
    %153 = vector.load %arg5[%c16, %c0_77] : memref<18x1xf32, #tpu.memory_space<vmem>>, vector<2x1xf32>
    %154 = vector.broadcast %153 : vector<2x1xf32> to vector<2x256xf32>
    %155 = arith.mulf %104, %154 : vector<2x256xf32>
    %cst_78 = arith.constant dense<0.000000e+00> : vector<256xf32>
    %156 = vector.multi_reduction <add>, %155, %cst_78 [0] : vector<2x256xf32> to vector<256xf32>
    %157 = vector.shape_cast %156 : vector<256xf32> to vector<1x256xf32>
    %158 = arith.addf %152, %157 : vector<1x256xf32>
    %c0_79 = arith.constant 0 : index
    %c0_80 = arith.constant 0 : index
    %159 = vector.load %arg6[%c0_79, %c0_80] : memref<1x1xf32, #tpu.memory_space<vmem>>, vector<1x1xf32>
    %160 = vector.broadcast %159 : vector<1x1xf32> to vector<1x256xf32>
    %161 = arith.addf %158, %160 : vector<1x256xf32>
    %162 = arith.negf %161 : vector<1x256xf32>
    %163 = math.exp %162 : vector<1x256xf32>
    %cst_81 = arith.constant 1.000000e+00 : f32
    %164 = vector.broadcast %cst_81 : f32 to vector<1x256xf32>
    %165 = arith.addf %164, %163 : vector<1x256xf32>
    %166 = arith.divf %164, %165 : vector<1x256xf32>
    %167 = vector.broadcast %166 : vector<1x256xf32> to vector<16x256xf32>
    %168 = arith.mulf %1, %167 : vector<16x256xf32>
    %cst_82 = arith.constant dense<0.000000e+00> : vector<16xf32>
    %169 = vector.multi_reduction <add>, %168, %cst_82 [1] : vector<16x256xf32> to vector<16xf32>
    %170 = vector.shape_cast %169 : vector<16xf32> to vector<16x1xf32>
    %cst_83 = arith.constant 2.560000e+02 : f32
    %171 = vector.broadcast %cst_83 : f32 to vector<16x1xf32>
    %172 = arith.divf %170, %171 : vector<16x1xf32>
    %c0_84 = arith.constant 0 : index
    %c0_85 = arith.constant 0 : index
    %173 = vector.load %arg7[%c0_84, %c0_85] : memref<2x16xf32, #tpu.memory_space<vmem>>, vector<2x16xf32>
    %cst_86 = arith.constant dense<0.000000e+00> : vector<2x1xf32>
    %174 = tpu.matmul %173, %172, %cst_86 {dimension_numbers = #tpu.dot_dimension_numbers<[1], [0], [0], [1], [0, 0, 1, 1], [], []>} : vector<2x16xf32>, vector<16x1xf32>, vector<2x1xf32> -> vector<2x1xf32>
    %c0_87 = arith.constant 0 : index
    %c0_88 = arith.constant 0 : index
    %175 = vector.load %arg8[%c0_87, %c0_88] : memref<2x1xf32, #tpu.memory_space<vmem>>, vector<2x1xf32>
    %176 = arith.addf %174, %175 : vector<2x1xf32>
    %cst_89 = arith.constant 0.000000e+00 : f32
    %177 = vector.broadcast %cst_89 : f32 to vector<2x1xf32>
    %178 = arith.maximumf %176, %177 : vector<2x1xf32>
    %c0_90 = arith.constant 0 : index
    %c0_91 = arith.constant 0 : index
    %179 = vector.load %arg9[%c0_90, %c0_91] : memref<16x2xf32, #tpu.memory_space<vmem>>, vector<16x2xf32>
    %cst_92 = arith.constant dense<0.000000e+00> : vector<16x1xf32>
    %180 = tpu.matmul %179, %178, %cst_92 {dimension_numbers = #tpu.dot_dimension_numbers<[1], [0], [0], [1], [0, 0, 1, 1], [], []>} : vector<16x2xf32>, vector<2x1xf32>, vector<16x1xf32> -> vector<16x1xf32>
    %c0_93 = arith.constant 0 : index
    %c0_94 = arith.constant 0 : index
    %181 = vector.load %arg10[%c0_93, %c0_94] : memref<16x1xf32, #tpu.memory_space<vmem>>, vector<16x1xf32>
    %182 = arith.addf %180, %181 : vector<16x1xf32>
    %183 = arith.negf %182 : vector<16x1xf32>
    %184 = math.exp %183 : vector<16x1xf32>
    %cst_95 = arith.constant 1.000000e+00 : f32
    %185 = vector.broadcast %cst_95 : f32 to vector<16x1xf32>
    %186 = arith.addf %185, %184 : vector<16x1xf32>
    %187 = arith.divf %185, %186 : vector<16x1xf32>
    %188 = vector.broadcast %187 : vector<16x1xf32> to vector<16x256xf32>
    %189 = arith.mulf %168, %188 : vector<16x256xf32>
    %c0_96 = arith.constant 0 : index
    %c0_97 = arith.constant 0 : index
    %c0_98 = arith.constant 0 : index
    %190 = vector.load %arg11[%c0_96, %c0_97, %c0_98] : memref<1x16x256xf32, #tpu.memory_space<vmem>>, vector<1x16x256xf32>
    %191 = vector.shape_cast %190 : vector<1x16x256xf32> to vector<16x256xf32>
    %192 = vector.shape_cast %189 : vector<16x256xf32> to vector<1x16x256xf32>
    tpu.vector_store %arg11[%c0_96, %c0_97, %c0_98], %192 {strides = array<i32>} : memref<1x16x256xf32, #tpu.memory_space<vmem>>, vector<1x16x256xf32>,
    return
  }
  func.func @transform_0(%arg0: i32) -> (i32, i32, i32) {
    %c0_i32 = arith.constant 0 : i32
    %c0_i32_0 = arith.constant 0 : i32
    %c0_i32_1 = arith.constant 0 : i32
    return %arg0, %c0_i32, %c0_i32_0 : i32, i32, i32
  }
  func.func @transform_1(%arg0: i32) -> (i32, i32, i32) {
    %c0_i32 = arith.constant 0 : i32
    %c0_i32_0 = arith.constant 0 : i32
    %c0_i32_1 = arith.constant 0 : i32
    %c0_i32_2 = arith.constant 0 : i32
    return %c0_i32, %c0_i32_0, %c0_i32_1 : i32, i32, i32
  }
  func.func @transform_2(%arg0: i32) -> (i32, i32) {
    %c0_i32 = arith.constant 0 : i32
    %c0_i32_0 = arith.constant 0 : i32
    %c0_i32_1 = arith.constant 0 : i32
    return %c0_i32, %c0_i32_0 : i32, i32
  }
  func.func @transform_3(%arg0: i32) -> (i32, i32) {
    %c0_i32 = arith.constant 0 : i32
    %c0_i32_0 = arith.constant 0 : i32
    %c0_i32_1 = arith.constant 0 : i32
    return %c0_i32, %c0_i32_0 : i32, i32
  }
  func.func @transform_4(%arg0: i32) -> (i32, i32) {
    %c0_i32 = arith.constant 0 : i32
    %c0_i32_0 = arith.constant 0 : i32
    %c0_i32_1 = arith.constant 0 : i32
    return %c0_i32, %c0_i32_0 : i32, i32
  }
  func.func @transform_5(%arg0: i32) -> (i32, i32) {
    %c0_i32 = arith.constant 0 : i32
    %c0_i32_0 = arith.constant 0 : i32
    %c0_i32_1 = arith.constant 0 : i32
    return %c0_i32, %c0_i32_0 : i32, i32
  }
  func.func @transform_6(%arg0: i32) -> (i32, i32) {
    %c0_i32 = arith.constant 0 : i32
    %c0_i32_0 = arith.constant 0 : i32
    %c0_i32_1 = arith.constant 0 : i32
    return %c0_i32, %c0_i32_0 : i32, i32
  }
  func.func @transform_7(%arg0: i32) -> (i32, i32) {
    %c0_i32 = arith.constant 0 : i32
    %c0_i32_0 = arith.constant 0 : i32
    %c0_i32_1 = arith.constant 0 : i32
    return %c0_i32, %c0_i32_0 : i32, i32
  }
  func.func @transform_8(%arg0: i32) -> (i32, i32) {
    %c0_i32 = arith.constant 0 : i32
    %c0_i32_0 = arith.constant 0 : i32
    %c0_i32_1 = arith.constant 0 : i32
    return %c0_i32, %c0_i32_0 : i32, i32
  }
  func.func @transform_9(%arg0: i32) -> (i32, i32) {
    %c0_i32 = arith.constant 0 : i32
    %c0_i32_0 = arith.constant 0 : i32
    %c0_i32_1 = arith.constant 0 : i32
    return %c0_i32, %c0_i32_0 : i32, i32
  }
  func.func @transform_10(%arg0: i32) -> (i32, i32, i32) {
    %c0_i32 = arith.constant 0 : i32
    %c0_i32_0 = arith.constant 0 : i32
    %c0_i32_1 = arith.constant 0 : i32
    return %arg0, %c0_i32, %c0_i32_0 : i32, i32, i32
  }
}

</mosaic_0001>

<bundles_post_ra>
// kernel: deep_attention_block.1
= control target key start
LH: loop header
LB: loop body
LE: loop exit
PB: predicated region body
PF: predicated region fallthrough
CT: control target
= control target key end

     0   :  { %s1838_s15 = smov 0   ;;  %s2510_s0 = inlined_call_operand.vmem [shape: f32[2,16,256], index: 0, kind: input, shape index: {}, may-alias: {0,10}]   ;;  %s2511_s1 = inlined_call_operand.vmem [shape: f32[9,1,256], index: 1, kind: input, shape index: {}]   ;;  %s2512_s2 = inlined_call_operand.vmem [shape: f32[2,144], index: 2, kind: input, shape index: {}]   ;;  %s2513_s3 = inlined_call_operand.vmem [shape: f32[2,1], index: 3, kind: input, shape index: {}]   ;;  %s2514_s4 = inlined_call_operand.vmem [shape: f32[18,1], index: 4, kind: input, shape index: {}]   ;;  %s2515_s5 = inlined_call_operand.<no memory space> [shape: f32[1,1], index: 5, kind: input, shape index: {}]   ;;  %s2516_s6 = inlined_call_operand.vmem [shape: f32[2,16], index: 6, kind: input, shape index: {}]   ;;  %s2517_s7 = inlined_call_operand.vmem [shape: f32[2,1], index: 7, kind: input, shape index: {}]   ;;  %s2518_s8 = inlined_call_operand.vmem [shape: f32[16,2], index: 8, kind: input, shape index: {}]   ;;  %s2519_s9 = inlined_call_operand.vmem [shape: f32[16,1], index: 9, kind: input, shape index: {}]   ;;  %s2520_s10 = inlined_call_operand.vmem [shape: f32[2,16,256], index: 10, kind: output, shape index: {}, may-alias: {0,10}]  }
   0x1   :  { %v15_v0 = vstv %s2515_s5 }
   0x2   :  { %16 = vst [vmem:[#allocation2] sm:$0x1] %v15_v0 }
   0x3 LB: > { %s1655_s16 = sadd.s32 4294967295, %s1759_s15   ;;  %p1659_p0 = scmp.ge.s32.totalorder %s1759_s15, 1  ;;  %s1759_s15 = sphi %s1838_s15, %s22_s15  }
   0x4   : > { %p314_p1 = scmp.lt.s32.totalorder %s1759_s15, 3 }
   0x6   : > { %p315_p2 = pnand %p1659_p0, %p314_p1 }
   0x8   : > { %318 = sbr.rel (%p315_p2) target bundleno = 1596 (0x63c), region = 60 }
   0xd   : > { %p352_p3 = scmp.lt.s32.totalorder %s1655_s16, 1  ;;  %v393_v1 = vlaneseq  ;;  %v1670_v4 = vld [vmem:[%s2511_s1 + $0xe] sm:$0x3]  ;;  %s1761_s22 = smov 17   ;;  %v1669_v12 = vld [vmem:[%s2511_s1 + $0xc] sm:$0x3] }
   0xe   : > { %s1762_s23 = smov 33   ;;  %v1668_v15 = vld [vmem:[%s2511_s1 + $0xa] sm:$0x3]  ;;  %s1763_s28 = smov 32   ;;  %v1667_v18 = vld [vmem:[%s2511_s1 + $0x8] sm:$0x3] }
   0xf   : > { %s2550_s16 = smov (!%p352_p3, %s1655_s16), 1  ;;  %v394_v2 = vshrl.u32 %v393_v1, 7  ;;  %s1764_s11 = smov 18   ;;  %v1666_v21 = vld [vmem:[%s2511_s1 + $0x6] sm:$0x3]  ;;  %vm378_vm0 = vcmask 138240  }
  0x10   : > { %s2526_s5 = sshll.u32 %s2550_s16, 5  ;;  %v1665_v24 = vld [vmem:[%s2511_s1 + $0x4] sm:$0x3]  ;;  %s1765_s18 = smov 16   ;;  %v1664_v27 = vld [vmem:[%s2511_s1 + $0x2] sm:$0x3] }
  0x11   : > { %v1849_v3 = vsub.s32 0, %v394_v2  ;;  %s1859_s21 = scalar_lea.vmem %s2510_s0, %s2526_s5  ;;  %v1866_v8 = vsub.s32 1, %v394_v2  ;;  %v1671_v30 = vld [vmem:[%s2511_s1 + $0x10] sm:$0x3]  ;;  %s1767_s26 = smov 1   ;;  %vm577_vm1 = vcmask 269312  }
  0x12   : > { %v364_v5 = vld [vmem:[%s1859_s21 + $0x10] sm:$0xff]  ;;  %v363_v6 = vld [vmem:[%s1859_s21 + $0x8] sm:$0xff]  ;;  %v365_v9 = vld [vmem:[%s1859_s21 + $0x18] sm:$0xff]  ;;  %s1768_s27 = smov 34   ;;  %s1770_s29 = smov 96   ;;  %vm551_vm2 = vcmask 261120  }
  0x13   : > { %374 = vrot.lane.b32.xlu0 %v364_v5, %s1761_s22  ;;  %372 = vrot.lane.b32.xlu1 %v363_v6, %s1761_s22  ;;  %v568_v7 = vrot.slane %v1670_v4, %v1849_v3  ;;  %v572_v10 = vrot.slane %v1670_v4, %v1866_v8  ;;  %v362_v11 = vld [vmem:[%s1859_s21] sm:$0xff]  ;;  %v546_v13 = vrot.slane %v1669_v12, %v1866_v8  ;;  %s1771_s30 = smov 110   ;;  %s1773_s12 = smov 112   ;;  %vm525_vm3 = vcmask 146432  }
  0x14   : > { %v542_v14 = vrot.slane %v1669_v12, %v1849_v3  ;;  %v520_v16 = vrot.slane %v1668_v15, %v1866_v8  ;;  %v516_v17 = vrot.slane %v1668_v15, %v1849_v3  ;;  %v495_v19 = vrot.slane %v1667_v18, %v1866_v8  ;;  %s1774_s13 = smov 126   ;;  %s1775_s14 = smov 127  }
  0x15   : > { %v491_v20 = vrot.slane %v1667_v18, %v1849_v3  ;;  %v469_v22 = vrot.slane %v1666_v21, %v1866_v8  ;;  %v465_v23 = vrot.slane %v1666_v21, %v1849_v3  ;;  %v443_v25 = vrot.slane %v1665_v24, %v1866_v8  ;;  %s1776_s19 = smov 94   ;;  %s2548_s17 = sshll.u32 %s2550_s16, 5 }
  0x16   : > { %v439_v26 = vrot.slane %v1665_v24, %v1849_v3  ;;  %v417_v28 = vrot.slane %v1664_v27, %v1866_v8  ;;  %v413_v29 = vrot.slane %v1664_v27, %v1849_v3  ;;  %v598_v31 = vrot.slane %v1671_v30, %v1866_v8 }
  0x17   : > { %376 = vrot.lane.b32.xlu0 %v365_v9, %s1761_s22  ;;  %573 = vrot.lane.b32.xlu1 %v568_v7, %s1762_s23  ;;  %v594_v32 = vrot.slane %v1671_v30, %v1849_v3  ;;  %vm2528_vm4 = vcmask 130048   ;;  %vm2527_vm5 = vcmask 15360   ;;  %vm422_vm6 = vcmask 7168  }
  0x18   : > { %vm603_vm7 = vcmask 277504   ;;  %vm2530_vm8 = vcmask 777216   ;;  %vm767_vm9 = vcmask 785408   ;;  %vm740_vm10 = vcmask 900096  }
  0x19   : > { %vm713_vm11 = vcmask 908288   ;;  %vm686_vm12 = vcmask 916480   ;;  %vm659_vm13 = vcmask 1031168   ;;  %vm632_vm14 = vcmask 1039360  }
  0x1a   : > { %vm2529_vm15 = vcmask 769024  }
  0x1b   : > { %575 = vrot.lane.b32.xlu1 %v572_v10, %s1762_s23  ;;  %370 = vrot.lane.b32.xlu0 %v362_v11, %s1761_s22  ;;  %s1766_s23 = smov 2  }
  0x1f   : > { %549 = vrot.lane.b32.xlu1 %v546_v13, %s1763_s28  ;;  %547 = vrot.lane.b32.xlu0 %v542_v14, %s1763_s28  ;;  %s1769_s28 = smov 95  }
  0x23   : > { %523 = vrot.lane.b32.xlu1 %v520_v16, %s1764_s11  ;;  %521 = vrot.lane.b32.xlu0 %v516_v17, %s1764_s11  ;;  %s1772_s11 = smov 111  }
  0x27   : > { %498 = vrot.lane.b32.xlu1 %v495_v19, %s1761_s22  ;;  %496 = vrot.lane.b32.xlu0 %v491_v20, %s1761_s22 }
  0x2b   : > { %472 = vrot.lane.b32.xlu1 %v469_v22, %s1765_s18  ;;  %470 = vrot.lane.b32.xlu0 %v465_v23, %s1765_s18 }
  0x2f   : > { %446 = vrot.lane.b32.xlu1 %v443_v25, %s1766_s23  ;;  %444 = vrot.lane.b32.xlu0 %v439_v26, %s1766_s23 }
  0x33   : > { %420 = vrot.lane.b32.xlu1 %v417_v28, %s1767_s26  ;;  %418 = vrot.lane.b32.xlu0 %v413_v29, %s1767_s26 }
  0x37   : > { %601 = vrot.lane.b32.xlu1 %v598_v31, %s1768_s27  ;;  %599 = vrot.lane.b32.xlu0 %v594_v32, %s1768_s27 }
  0x85   : > { %v1910_v33 = vpop.permute.xlu0 %374  ;;  %v1912_v34 = vpop.permute.xlu1 %372 }
  0x86   : > { %v1916_v35 = vsel %vm378_vm0, 0.0, %v1910_v33  ;;  %v1931_v40 = vsel %vm378_vm0, %v1912_v34, 0.0 }
  0x89   : > { %v1918_v36 = vpop.permute.xlu0 %376  ;;  %v1920_v37 = vpop.permute.xlu1 %573 }
  0x8a   : > { %2531 = vst [vmem:[#allocation3_spill] sm:$0xff] %v1920_v37  ;;  %v585_v38 = vmul.f32 %v1920_v37, %v1916_v35  ;;  %v1926_v39 = vsel %vm378_vm0, %v1918_v36, 0.0  ;;  %v2050_v21 = vsel %vm378_vm0, %v1910_v33, %v1918_v36 }
  0x8c   : > { %788 = vrot.lane.b32.xlu0 %v585_v38, %s1769_s28 }
  0x8d   : > { %v1933_v41 = vpop.permute.xlu1 %575  ;;  %v1935_v42 = vpop.permute.xlu0 %370 }
  0x8e   : > { %2532 = vst [vmem:[#allocation4_spill] sm:$0xff] %v1933_v41  ;;  %v587_v43 = vmul.f32 %v1933_v41, %v1926_v39  ;;  %v584_v44 = vmul.f32 %v1933_v41, %v1931_v40  ;;  %v1943_v45 = vsel %vm378_vm0, 0.0, %v1935_v42  ;;  %v2043_v20 = vsel %vm577_vm1, %v1920_v37, %v1933_v41 }
  0x8f   : > { %v582_v47 = vmul.f32 %v1920_v37, %v1943_v45  ;;  %2534 = vst [vmem:[#allocation6_spill] sm:$0xff] %v2043_v20  ;;  %v586_v22 = vmul.f32 %v2043_v20, %v2050_v21  ;;  %v2059_v24 = vsel %vm378_vm0, %v1935_v42, %v1912_v34  ;;  %vm1041_vm1 = vcmask 1041424  }
  0x90   : > { %792 = vrot.lane.b32.xlu1 %v587_v43, %s1769_s28  ;;  %786 = vrot.lane.b32.xlu0 %v584_v44, %s1769_s28  ;;  %v583_v27 = vmul.f32 %v2043_v20, %v2059_v24 }
  0x91   : > { %v1947_v46 = vpop.permute.xlu0 %547  ;;  %v1953_v49 = vpop.permute.xlu1 %549 }
  0x92   : > { %v559_v48 = vmul.f32 %v1947_v46, %v1916_v35  ;;  %v561_v50 = vmul.f32 %v1953_v49, %v1926_v39  ;;  %v558_v51 = vmul.f32 %v1953_v49, %v1931_v40  ;;  %v556_v53 = vmul.f32 %v1947_v46, %v1943_v45 }
  0x93   : > { %v2063_v25 = vsel %vm551_vm2, %v1947_v46, %v1953_v49  ;;  %vm994_vm2 = vcmask 1041416  }
  0x94   : > { %782 = vrot.lane.b32.xlu1 %v582_v47, %s1769_s28  ;;  %761 = vrot.lane.b32.xlu0 %v559_v48, %s1770_s29  ;;  %v560_v26 = vmul.f32 %v2063_v25, %v2050_v21  ;;  %v557_v30 = vmul.f32 %v2063_v25, %v2059_v24 }
  0x95   : > { %v1961_v52 = vpop.permute.xlu0 %521  ;;  %v1969_v55 = vpop.permute.xlu1 %523 }
  0x96   : > { %v533_v54 = vmul.f32 %v1961_v52, %v1916_v35  ;;  %v535_v56 = vmul.f32 %v1969_v55, %v1926_v39  ;;  %v532_v57 = vmul.f32 %v1969_v55, %v1931_v40  ;;  %v530_v59 = vmul.f32 %v1961_v52, %v1943_v45 }
  0x97   : > { %v2073_v28 = vsel %vm525_vm3, %v1961_v52, %v1969_v55  ;;  %vm1135_vm3 = vcmask 1041544  }
  0x98   : > { %765 = vrot.lane.b32.xlu1 %v561_v50, %s1770_s29  ;;  %759 = vrot.lane.b32.xlu0 %v558_v51, %s1770_s29  ;;  %v534_v29 = vmul.f32 %v2073_v28, %v2050_v21  ;;  %v531_v33 = vmul.f32 %v2073_v28, %v2059_v24 }
  0x99   : > { %v1977_v58 = vpop.permute.xlu0 %496  ;;  %v1985_v61 = vpop.permute.xlu1 %498 }
  0x9a   : > { %v507_v60 = vmul.f32 %v1977_v58, %v1916_v35  ;;  %v509_v62 = vmul.f32 %v1985_v61, %v1926_v39  ;;  %v506_v63 = vmul.f32 %v1985_v61, %v1931_v40  ;;  %v504_v1 = vmul.f32 %v1977_v58, %v1943_v45 }
  0x9b   : > { %v2084_v31 = vsel %vm378_vm0, %v1977_v58, %v1985_v61 }
  0x9c   : > { %755 = vrot.lane.b32.xlu1 %v556_v53, %s1770_s29  ;;  %734 = vrot.lane.b32.xlu0 %v533_v54, %s1771_s30  ;;  %v508_v32 = vmul.f32 %v2084_v31, %v2050_v21  ;;  %v505_v38 = vmul.f32 %v2084_v31, %v2059_v24 }
  0x9d   : > { %v1993_v0 = vpop.permute.xlu0 %470  ;;  %v2001_v4 = vpop.permute.xlu1 %472 }
  0x9e   : > { %v482_v2 = vmul.f32 %v1993_v0, %v1916_v35  ;;  %v484_v5 = vmul.f32 %v2001_v4, %v1926_v39  ;;  %v481_v6 = vmul.f32 %v2001_v4, %v1931_v40  ;;  %v479_v9 = vmul.f32 %v1993_v0, %v1943_v45 }
  0x9f   : > { %v2095_v34 = vsel %vm2528_vm4, %v1993_v0, %v2001_v4 }
  0xa0   : > { %738 = vrot.lane.b32.xlu1 %v535_v56, %s1771_s30  ;;  %732 = vrot.lane.b32.xlu0 %v532_v57, %s1771_s30  ;;  %v483_v36 = vmul.f32 %v2095_v34, %v2050_v21  ;;  %v480_v44 = vmul.f32 %v2095_v34, %v2059_v24 }
  0xa1   : > { %v2009_v7 = vpop.permute.xlu0 %444  ;;  %v2017_v11 = vpop.permute.xlu1 %446 }
  0xa2   : > { %v456_v10 = vmul.f32 %v2009_v7, %v1916_v35  ;;  %2533 = vst [vmem:[#allocation5_spill] sm:$0xff] %v2017_v11  ;;  %v458_v12 = vmul.f32 %v2017_v11, %v1926_v39  ;;  %v455_v13 = vmul.f32 %v2017_v11, %v1931_v40  ;;  %v453_v15 = vmul.f32 %v2009_v7, %v1943_v45 }
  0xa3   : > { %v2106_v42 = vsel %vm2527_vm5, %v2009_v7, %v2017_v11  ;;  %vm1009_vm5 = vcmask 1024  }
  0xa4   : > { %728 = vrot.lane.b32.xlu1 %v530_v59, %s1771_s30  ;;  %707 = vrot.lane.b32.xlu0 %v507_v60, %s1772_s11  ;;  %2535 = vst [vmem:[#allocation7_spill] sm:$0xff] %v2106_v42  ;;  %v457_v43 = vmul.f32 %v2106_v42, %v2050_v21  ;;  %v454_v51 = vmul.f32 %v2106_v42, %v2059_v24  ;;  %v2141_v59 = vld.sshfl [vmem:[%s2512_s2] sm:$0x33 pattern:$0x76325410] }
  0xa5   : > { %v2025_v14 = vpop.permute.xlu0 %418  ;;  %v2033_v17 = vpop.permute.xlu1 %420  ;;  %v845_v60 = vcombine.high %v2141_v59, %v2141_v59 }
  0xa6   : > { %v430_v16 = vmul.f32 %v2025_v14, %v1916_v35  ;;  %v432_v18 = vmul.f32 %v2033_v17, %v1926_v39  ;;  %v429_v19 = vmul.f32 %v2033_v17, %v1931_v40  ;;  %v427_v23 = vmul.f32 %v2025_v14, %v1943_v45 }
  0xa7   : > { %v2116_v47 = vsel %vm422_vm6, %v2025_v14, %v2033_v17  ;;  %1673 = vmatprep.mubr.msk.f32.mxu0 %vm2528_vm4, %v845_v60  ;;  %vm968_vm6 = vcmask 1041408   ;;  %vm1323_vm4 = vcmask 1041680  }
  0xa8   : > { %711 = vrot.lane.b32.xlu1 %v509_v62, %s1772_s11  ;;  %705 = vrot.lane.b32.xlu0 %v506_v63, %s1772_s11  ;;  %v431_v53 = vmul.f32 %v2116_v47, %v2050_v21  ;;  %v428_v56 = vmul.f32 %v2116_v47, %v2059_v24 }
  0xa9   : > { %v2118_v48 = vpop.permute.xlu1 %601  ;;  %v2120_v50 = vpop.permute.xlu0 %599 }
  0xaa   : > { %v2130_v54 = vsel %vm603_vm7, %v2120_v50, %v2118_v48  ;;  %v613_v62 = vmul.f32 %v2118_v48, %v1926_v39  ;;  %v611_v63 = vmul.f32 %v2120_v50, %v1916_v35  ;;  %v831_v39 = vld [vmem:[%s2513_s3] sm:$0x3]  ;;  %vm1088_vm7 = vcmask 1041536  }
  0xab   : > { %v612_v57 = vmul.f32 %v2130_v54, %v2050_v21 }
  0xac   : > { %701 = vrot.lane.b32.xlu1 %v504_v1, %s1772_s11  ;;  %680 = vrot.lane.b32.xlu0 %v482_v2, %s1773_s12  ;;  %v1777_v1 = vmov 0   ;;  %v610_v2 = vmul.f32 %v2118_v48, %v1931_v40  ;;  %v985_v40 = vld [vmem:[%s2514_s4 + $0x2] sm:$0x3] }
  0xad   : > { %1731 = vset.pattern.permute.xlu0 %v1777_v1  ;;  %1732 = vset.pattern.permute.xlu1 %v1777_v1 }
  0xb0   : > { %684 = vrot.lane.b32.xlu1 %v484_v5, %s1773_s12  ;;  %678 = vrot.lane.b32.xlu0 %v481_v6, %s1773_s12  ;;  %v609_v5 = vmul.f32 %v2130_v54, %v2059_v24  ;;  %v608_v6 = vmul.f32 %v2120_v50, %v1943_v45 }
  0xb4   : > { %674 = vrot.lane.b32.xlu1 %v479_v9, %s1773_s12  ;;  %653 = vrot.lane.b32.xlu0 %v456_v10, %s1774_s13  ;;  %v1032_v9 = vld [vmem:[%s2514_s4 + $0x4] sm:$0x3] }
  0xb8   : > { %657 = vrot.lane.b32.xlu1 %v458_v12, %s1774_s13  ;;  %651 = vrot.lane.b32.xlu0 %v455_v13, %s1774_s13 }
  0xbc   : > { %647 = vrot.lane.b32.xlu1 %v453_v15, %s1774_s13  ;;  %626 = vrot.lane.b32.xlu0 %v430_v16, %s1775_s14 }
  0xc0   : > { %630 = vrot.lane.b32.xlu1 %v432_v18, %s1775_s14  ;;  %624 = vrot.lane.b32.xlu0 %v429_v19, %s1775_s14 }
  0xc4   : > { %790 = vrot.lane.b32.xlu0 %v586_v22, %s1769_s28  ;;  %620 = vrot.lane.b32.xlu1 %v427_v23, %s1775_s14 }
  0xc8   : > { %763 = vrot.lane.b32.xlu0 %v560_v26, %s1770_s29  ;;  %784 = vrot.lane.b32.xlu1 %v583_v27, %s1769_s28 }
  0xcc   : > { %736 = vrot.lane.b32.xlu0 %v534_v29, %s1771_s30  ;;  %757 = vrot.lane.b32.xlu1 %v557_v30, %s1770_s29 }
  0xd0   : > { %709 = vrot.lane.b32.xlu0 %v508_v32, %s1772_s11  ;;  %730 = vrot.lane.b32.xlu1 %v531_v33, %s1771_s30 }
  0xd4   : > { %682 = vrot.lane.b32.xlu0 %v483_v36, %s1773_s12  ;;  %703 = vrot.lane.b32.xlu1 %v505_v38, %s1772_s11 }
  0xd8   : > { %655 = vrot.lane.b32.xlu0 %v457_v43, %s1774_s13  ;;  %676 = vrot.lane.b32.xlu1 %v480_v44, %s1773_s12 }
  0xdc   : > { %649 = vrot.lane.b32.xlu1 %v454_v51, %s1774_s13  ;;  %628 = vrot.lane.b32.xlu0 %v431_v53, %s1775_s14 }
  0xe0   : > { %622 = vrot.lane.b32.xlu1 %v428_v56, %s1775_s14  ;;  %817 = vrot.lane.b32.xlu0 %v612_v57, %s1776_s19 }
  0xe4   : > { %819 = vrot.lane.b32.xlu1 %v613_v62, %s1776_s19  ;;  %815 = vrot.lane.b32.xlu0 %v611_v63, %s1776_s19 }
  0xe8   : > { %813 = vrot.lane.b32.xlu0 %v610_v2, %s1776_s19  ;;  %811 = vrot.lane.b32.xlu1 %v609_v5, %s1776_s19 }
  0xec   : > { %809 = vrot.lane.b32.xlu1 %v608_v6, %s1776_s19  ;;  %834 = vperm.xlu0 %1731, %v831_v39  }
  0xf0   : > { %988 = vperm.xlu1 %1732, %v985_v40  }
  0xf4   : > { %1035 = vperm.xlu1 %1732, %v1032_v9  }
  0xfe   : > { %v789_v10 = vpop.permute.xlu0 %788 }
 0x102   : > { %v793_v12 = vpop.permute.xlu1 %792  ;;  %v787_v13 = vpop.permute.xlu0 %786 }
 0x106   : > { %v783_v15 = vpop.permute.xlu1 %782  ;;  %v762_v16 = vpop.permute.xlu0 %761 }
 0x10a   : > { %v766_v18 = vpop.permute.xlu1 %765  ;;  %v760_v19 = vpop.permute.xlu0 %759 }
 0x10e   : > { %v756_v22 = vpop.permute.xlu1 %755  ;;  %v735_v23 = vpop.permute.xlu0 %734 }
 0x112   : > { %v739_v26 = vpop.permute.xlu1 %738  ;;  %v733_v27 = vpop.permute.xlu0 %732 }
 0x116   : > { %v729_v29 = vpop.permute.xlu1 %728  ;;  %v708_v30 = vpop.permute.xlu0 %707 }
 0x11a   : > { %v712_v32 = vpop.permute.xlu1 %711  ;;  %v706_v33 = vpop.permute.xlu0 %705 }
 0x11e   : > { %v702_v36 = vpop.permute.xlu1 %701  ;;  %v2172_v38 = vpop.permute.xlu0 %680 }
 0x122   : > { %v685_v43 = vpop.permute.xlu1 %684  ;;  %v2174_v44 = vpop.permute.xlu0 %678 }
 0x126   : > { %v2176_v51 = vpop.permute.xlu1 %674  ;;  %v2178_v53 = vpop.permute.xlu0 %653 }
 0x12a   : > { %v2180_v56 = vpop.permute.xlu1 %657  ;;  %v2182_v57 = vpop.permute.xlu0 %651 }
 0x12e   : > { %v2184_v60 = vpop.permute.xlu1 %647  ;;  %v2186_v62 = vpop.permute.xlu0 %626 }
 0x132   : > { %v2188_v63 = vpop.permute.xlu1 %630  ;;  %v2190_v1 = vpop.permute.xlu0 %624 }
 0x136   : > { %v2192_v2 = vpop.permute.xlu1 %620  ;;  %v791_v5 = vpop.permute.xlu0 %790 }
 0x137   : > { %v798_v39 = vsel %vm2530_vm8, %v791_v5, %v793_v12  ;;  %v797_v6 = vsel %vm2530_vm8, %v789_v10, %v791_v5 }
 0x138   : > { %849 = vmatprep.subr.mxu0 %v798_v39 }
 0x139   : > { %850 = vmatpush1.msra.mxu0 %v797_v6 }
 0x13a   : > { %v785_v40 = vpop.permute.xlu1 %784  ;;  %v764_v9 = vpop.permute.xlu0 %763 }
 0x13b   : > { %v796_v42 = vsel %vm2530_vm8, %v785_v40, %v787_v13  ;;  %v795_v11 = vsel %vm2530_vm8, %v783_v15, %v785_v40  ;;  %v771_v20 = vsel %vm767_vm9, %v764_v9, %v766_v18  ;;  %v770_v12 = vsel %vm767_vm9, %v762_v16, %v764_v9 }
 0x13c   : > { %851 = vmatprep.subr.mxu0 %v796_v42  ;;  %vm1103_vm8 = vcmask 123904  }
 0x13d   : > { %852 = vmatpush1.msra.mxu0 %v795_v11 }
 0x13e   : > { %v758_v37 = vpop.permute.xlu1 %757  ;;  %853 = vmatprep.subr.mxu0 %v771_v20  ;;  %v737_v41 = vpop.permute.xlu0 %736 }
 0x13f   : > { %854 = vmatpush1.msra.mxu0 %v770_v12  ;;  %v769_v10 = vsel %vm767_vm9, %v758_v37, %v760_v19  ;;  %v768_v5 = vsel %vm767_vm9, %v756_v22, %v758_v37  ;;  %v744_v13 = vsel %vm740_vm10, %v737_v41, %v739_v26  ;;  %v743_v42 = vsel %vm740_vm10, %v735_v23, %v737_v41 }
 0x140   : > { %855 = vmatprep.subr.mxu0 %v769_v10 }
 0x141   : > { %856 = vmatpush1.msra.mxu0 %v768_v5 }
 0x142   : > { %v731_v15 = vpop.permute.xlu1 %730  ;;  %857 = vmatprep.subr.mxu0 %v744_v13  ;;  %v710_v11 = vpop.permute.xlu0 %709 }
 0x143   : > { %858 = vmatpush1.msra.mxu0 %v743_v42  ;;  %v742_v20 = vsel %vm740_vm10, %v731_v15, %v733_v27  ;;  %v741_v16 = vsel %vm740_vm10, %v729_v29, %v731_v15  ;;  %v717_v18 = vsel %vm713_vm11, %v710_v11, %v712_v32  ;;  %v716_v22 = vsel %vm713_vm11, %v708_v30, %v710_v11 }
 0x144   : > { %859 = vmatprep.subr.mxu0 %v742_v20 }
 0x145   : > { %860 = vmatpush1.msra.mxu0 %v741_v16 }
 0x146   : > { %v704_v37 = vpop.permute.xlu1 %703  ;;  %861 = vmatprep.subr.mxu0 %v717_v18  ;;  %v683_v19 = vpop.permute.xlu0 %682 }
 0x147   : > { %862 = vmatpush1.msra.mxu0 %v716_v22  ;;  %v715_v26 = vsel %vm713_vm11, %v704_v37, %v706_v33  ;;  %v714_v41 = vsel %vm713_vm11, %v702_v36, %v704_v37  ;;  %v690_v23 = vsel %vm686_vm12, %v683_v19, %v685_v43  ;;  %v689_v32 = vsel %vm686_vm12, %v2172_v38, %v683_v19  ;;  %v391_v43 = vld [vmem:[%s2511_s1] sm:$0x3] }
 0x148   : > { %863 = vmatprep.subr.mxu0 %v715_v26  ;;  %v2234_v9 = vrot.slane %v391_v43, %v1849_v3  ;;  %v1126_v26 = vld [vmem:[%s2514_s4 + $0x8] sm:$0x3] }
 0x149   : > { %864 = vmatpush1.msra.mxu0 %v714_v41  ;;  %v1079_v41 = vld [vmem:[%s2514_s4 + $0x6] sm:$0x3] }
 0x14a   : > { %v677_v27 = vpop.permute.xlu1 %676  ;;  %865 = vmatprep.subr.mxu0 %v690_v23  ;;  %v656_v29 = vpop.permute.xlu0 %655  ;;  %v405_v10 = vmul.f32 %v2234_v9, %v1916_v35  ;;  %v1173_v23 = vld [vmem:[%s2514_s4 + $0xa] sm:$0x3] }
 0x14b   : > { %866 = vmatpush1.msra.mxu0 %v689_v32  ;;  %v688_v30 = vsel %vm686_vm12, %v677_v27, %v2174_v44  ;;  %v687_v33 = vsel %vm686_vm12, %v2176_v51, %v677_v27  ;;  %v663_v36 = vsel %vm659_vm13, %v656_v29, %v2180_v56  ;;  %v662_v6 = vsel %vm659_vm13, %v2178_v53, %v656_v29  ;;  %v1314_v27 = vld [vmem:[%s2514_s4 + $0x10] sm:$0x3]  ;;  %v1267_v29 = vld [vmem:[%s2514_s4 + $0xe] sm:$0x3]  ;;  %v1361_v32 = vld [vmem:[#allocation2] sm:$0x1] }
 0x14c   : > { %867 = vmatprep.subr.mxu0 %v688_v30  ;;  %v2229_v56 = vrot.slane %v391_v43, %v1866_v8  ;;  %v960_v30 = vld [vmem:[%s2514_s4] sm:$0x3] }
 0x14d   : > { %868 = vmatpush1.msra.mxu0 %v687_v33 }
 0x14e   : > { %v650_v39 = vpop.permute.xlu1 %649  ;;  %869 = vmatprep.subr.mxu0 %v663_v36  ;;  %v629_v38 = vpop.permute.xlu0 %628 }
 0x14f   : > { %870 = vmatpush1.msra.mxu0 %v662_v6  ;;  %v661_v44 = vsel %vm659_vm13, %v650_v39, %v2182_v57  ;;  %v660_v51 = vsel %vm659_vm13, %v2184_v60, %v650_v39  ;;  %v636_v40 = vsel %vm632_vm14, %v629_v38, %v2188_v63  ;;  %v635_v57 = vsel %vm632_vm14, %v2186_v62, %v629_v38 }
 0x150   : > { %871 = vmatprep.subr.mxu0 %v661_v44  ;;  %v406_v63 = vmul.f32 %v2229_v56, %v2050_v21  ;;  %v404_v62 = vmul.f32 %v2229_v56, %v2059_v24 }
 0x151   : > { %872 = vmatpush1.msra.mxu0 %v660_v51 }
 0x152   : > { %v623_v53 = vpop.permute.xlu1 %622  ;;  %873 = vmatprep.subr.mxu0 %v636_v40  ;;  %v818_v12 = vpop.permute.xlu0 %817 }
 0x153   : > { %874 = vmatpush1.msra.mxu0 %v635_v57  ;;  %v634_v60 = vsel %vm632_vm14, %v623_v53, %v2190_v1  ;;  %v633_v8 = vsel %vm632_vm14, %v2192_v2, %v623_v53  ;;  %v403_v1 = vmul.f32 %v2234_v9, %v1943_v45 }
 0x154   : > { %875 = vmatprep.subr.mxu0 %v634_v60 }
 0x155   : > { %876 = vmatpush1.msra.mxu0 %v633_v8 }
 0x156   : > { %v820_v5 = vpop.permute.xlu1 %819  ;;  %877 = vmatprep.subr.mxu0 %v406_v63  ;;  %v816_v13 = vpop.permute.xlu0 %815 }
 0x157   : > { %878 = vmatpush1.msra.mxu0 %v405_v10  ;;  %v825_v2 = vsel %vm2529_vm15, %v818_v12, %v820_v5  ;;  %v824_v35 = vsel %vm2529_vm15, %v816_v13, %v818_v12 }
 0x158   : > { %879 = vmatprep.subr.mxu0 %v404_v62 }
 0x159   : > { %880 = vmatpush1.msra.mxu0 %v403_v1 }
 0x15a   : > { %v812_v21 = vpop.permute.xlu1 %811  ;;  %909 = vmatprep.subr.mxu0 %v825_v2  ;;  %v814_v15 = vpop.permute.xlu0 %813 }
 0x15b   : > { %910 = vmatpush2.msra.mxu0 %v824_v35  ;;  %v823_v11 = vsel %vm2529_vm15, %v812_v21, %v814_v15 }
 0x15c   : > { %911 = vmatprep.subr.mxu0 %v823_v11 }
 0x15e   : > { %v810_v42 = vpop.permute.xlu1 %809 }
 0x15f   : > { %v822_v24 = vsel %vm2529_vm15, %v810_v42, %v812_v21  ;;  %vm1276_vm15 = vcmask 1041672  }
 0x160   : > { %912 = vmatpush2.msra.mxu0 %v822_v24 }
 0x161   : > { %914 = vmatmul.mubr.f32.vlgmr.msra.gmra.mxu0 %v2141_v59  ;;  %v1220_v59 = vld [vmem:[%s2514_s4 + $0xc] sm:$0x3] }
 0x167   : > { %v835_v45 = vpop.permute.xlu0 %834 }
 0x16b   : > { %v2278_v33 = vpop.permute.xlu1 %988 }
 0x16f   : > { %v2280_v36 = vpop.permute.xlu1 %1035 }
 0x221   : > { %v915_v20 = vpop.f32.mrf.mxu0 }
 0x222   : > { %v916_v16 = vadd.f32 %v915_v20, %v835_v45 }
 0x223   : > { %v917_v18 = vpop.f32.mrf.mxu0 }
 0x224   : > { %v920_v37 = vmax.f32 %v916_v16, 0.0  ;;  %v918_v19 = vadd.f32 %v917_v18, %v835_v45 }
 0x226   : > { %v921_v22 = vmax.f32 %v918_v19, 0.0  ;;  %924 = vrot.lane.b32.xlu1 %v920_v37, %s1761_s22 }
 0x228   : > { %926 = vrot.lane.b32.xlu0 %v921_v22, %s1761_s22  ;;  %v2537_v22 = vld [vmem:[#allocation3_spill] sm:$0xff]  ;;  %s361_s22 = scalar_lea.vmem %s2520_s10, %s2548_s17 }
 0x22a   : > { %1129 = vperm.xlu1 %1732, %v1126_v26  }
 0x22c   : > { %1082 = vperm.xlu0 %1731, %v1079_v41  }
 0x22e   : > { %1223 = vperm.xlu1 %1732, %v1220_v59  }
 0x230   : > { %1176 = vperm.xlu0 %1731, %v1173_v23  }
 0x232   : > { %1317 = vperm.xlu1 %1732, %v1314_v27   ;;  %v2538_v27 = vld [vmem:[#allocation6_spill] sm:$0xff] }
 0x234   : > { %1270 = vperm.xlu0 %1731, %v1267_v29  }
 0x236   : > { %1364 = vperm.xlu1 %1732, %v1361_v32  }
 0x238   : > { %963 = vperm.xlu0 %1731, %v960_v30  }
 0x298   : > { %v925_v43 = vpop.permute.xlu1 %924 }
 0x299   : > { %v2283_v39 = vsel %vm378_vm0, 0.0, %v925_v43 }
 0x29a   : > { %v939_v38 = vmul.f32 %v2283_v39, %v2009_v7  ;;  %v936_v6 = vmul.f32 %v2283_v39, %v2025_v14  ;;  %v927_v60 = vpop.permute.xlu0 %926  ;;  %v945_v62 = vmul.f32 %v2283_v39, %v1977_v58  ;;  %v942_v2 = vmul.f32 %v2283_v39, %v1993_v0 }
 0x29b   : > { %v2294_v7 = vsel %vm378_vm0, %v925_v43, %v927_v60  ;;  %v933_v14 = vsel %vm378_vm0, %v927_v60, 0.0  ;;  %v951_v21 = vmul.f32 %v2283_v39, %v1947_v46  ;;  %v948_v35 = vmul.f32 %v2283_v39, %v1961_v52 }
 0x29c   : > { %v1038_v44 = vmul.f32 %v2280_v36, %v939_v38  ;;  %v991_v51 = vmul.f32 %v2278_v33, %v936_v6  ;;  %v946_v11 = vmul.f32 %v2294_v7, %v2084_v31  ;;  %v947_v58 = vmul.f32 %v933_v14, %v1985_v61  ;;  %v2539_v6 = vld [vmem:[#allocation5_spill] sm:$0xff] }
 0x29d   : > { %vm1150_vm0 = vcmask 132096   ;;  %v944_v24 = vmul.f32 %v933_v14, %v2001_v4  ;;  %v943_v0 = vmul.f32 %v2294_v7, %v2095_v34  ;;  %v2315_v46 = vmul.f32 %v2294_v7, %v2063_v25 }
 0x29e   : > { %v1042_v40 = vsel %vm1041_vm1, %v1038_v44, 0.0  ;;  %v995_v53 = vsel %vm994_vm2, %v991_v51, 0.0  ;;  %vm1229_vm1 = vcmask 1041664   ;;  %vm1182_vm2 = vcmask 1041552  }
 0x29f   : > { %v1043_v12 = vrot.slane %v1042_v40, 4  ;;  %v996_v57 = vrot.slane %v995_v53, 4  ;;  %v937_v61 = vmul.f32 %v2294_v7, %v2116_v47  ;;  %v2323_v4 = vmul.f32 %v933_v14, %v1953_v49 }
 0x2a0   : > { %v2326_v20 = vmul.f32 %v933_v14, %v1969_v55  ;;  %v949_v25 = vmul.f32 %v2294_v7, %v2073_v28  ;;  %v957_v16 = vmul.f32 %v2283_v39, %v2120_v50  ;;  %v2334_v18 = vmul.f32 %v2294_v7, %v2130_v54  ;;  %v2536_v55 = vld [vmem:[#allocation4_spill] sm:$0xff] }
 0x2a1   : > { %v1044_v63 = vadd.f32 %v1043_v12, %v1042_v40  ;;  %v997_v10 = vadd.f32 %v996_v57, %v995_v53  ;;  %v938_v47 = vmul.f32 %v933_v14, %v2033_v17  ;;  %v2339_v37 = vmul.f32 %v933_v14, %v2118_v48  ;;  %v2540_v12 = vld [vmem:[#allocation7_spill] sm:$0xff] }
 0x2a2   : > { %v2342_v19 = vmul.f32 %v933_v14, %v2536_v55  ;;  %v954_v28 = vmul.f32 %v2283_v39, %v2537_v22  ;;  %v992_v17 = vmul.f32 %v2278_v33, %v937_v61  ;;  %v2354_v29 = vmul.f32 %v2294_v7, %v2538_v27 }
 0x2a3   : > { %v1045_v13 = vrot.slane %v1044_v63, 2  ;;  %v998_v1 = vrot.slane %v997_v10, 2  ;;  %v993_v38 = vmul.f32 %v2278_v33, %v938_v47  ;;  %v941_v44 = vmul.f32 %v933_v14, %v2539_v6 }
 0x2a4   : > { %v940_v57 = vmul.f32 %v2294_v7, %v2540_v12 }
 0x2a5   : > { %v1130_v8 = vpop.permute.xlu1 %1129  ;;  %v1046_v52 = vadd.f32 %v1045_v13, %v1044_v63  ;;  %v999_v34 = vadd.f32 %v998_v1, %v997_v10  ;;  %v2366_v10 = vsel %vm968_vm6, %v992_v17, 0.0 }
 0x2a6   : > { %v1132_v42 = vmul.f32 %v1130_v8, %v945_v62  ;;  %v1133_v59 = vmul.f32 %v1130_v8, %v946_v11  ;;  %v1134_v32 = vmul.f32 %v1130_v8, %v947_v58  ;;  %v1039_v61 = vmul.f32 %v2280_v36, %v940_v57 }
 0x2a7   : > { %v2291_v5 = vpop.permute.xlu0 %1082  ;;  %v1047_v41 = vrot.slane %v1046_v52, 1  ;;  %v1000_v48 = vrot.slane %v999_v34, 1 }
 0x2a8   : > { %v1085_v31 = vmul.f32 %v2291_v5, %v942_v2  ;;  %v1136_v49 = vsel %vm1135_vm3, %v1132_v42, 0.0  ;;  %vm1056_vm3 = vcmask 9216   ;;  %v1143_v33 = vsel %vm968_vm6, %v1133_v59, 0.0 }
 0x2a9   : > { %v2303_v15 = vpop.permute.xlu1 %1223  ;;  %v1137_v30 = vrot.slane %v1136_v49, 4  ;;  %v1048_v51 = vadd.f32 %v1047_v41, %v1046_v52  ;;  %v1001_v40 = vadd.f32 %v1000_v48, %v999_v34  ;;  %v1086_v14 = vmul.f32 %v2291_v5, %v943_v0 }
 0x2aa   : > { %v1226_v26 = vmul.f32 %v2303_v15, %v951_v21  ;;  %v1089_v23 = vsel %vm1088_vm7, %v1085_v31, 0.0  ;;  %vm1244_vm7 = vcmask 254976   ;;  %v1087_v13 = vmul.f32 %v2291_v5, %v944_v24 }
 0x2ab   : > { %v2317_v45 = vpop.permute.xlu0 %1176  ;;  %v1090_v60 = vrot.slane %v1089_v23, 4  ;;  %1067 = vrot.lane.b32.xlu0 %v1048_v51, %s1774_s13  ;;  %1020 = vrot.lane.b32.xlu1 %v1001_v40, %s1775_s14  ;;  %v1138_v1 = vadd.f32 %v1137_v30, %v1136_v49  ;;  %v1151_v2 = vsel %vm1150_vm0, %v1134_v32, 0.0  ;;  %v1010_v21 = vsel %vm1009_vm5, %v993_v38, 0.0 }
 0x2ac   : > { %v1179_v50 = vmul.f32 %v2317_v45, %v948_v35  ;;  %v1230_v63 = vsel %vm1229_vm1, %v1226_v26, 0.0  ;;  %v1040_v35 = vmul.f32 %v2280_v36, %v941_v44  ;;  %vm1197_vm1 = vcmask 140288  }
 0x2ad   : > { %v2348_v54 = vpop.permute.xlu1 %1317  ;;  %v1231_v11 = vrot.slane %v1230_v63, 4  ;;  %v1144_v24 = vrot.slane %v1143_v33, 4  ;;  %v1091_v0 = vadd.f32 %v1090_v60, %v1089_v23  ;;  %v1003_v52 = vrot.slane %v2366_v10, 4 }
 0x2ae   : > { %v1320_v53 = vmul.f32 %v2348_v54, %v957_v16  ;;  %v1183_v8 = vsel %vm1182_vm2, %v1179_v50, 0.0  ;;  %v1152_v31 = vrot.slane %v1151_v2, 4  ;;  %v1096_v34 = vsel %vm968_vm6, %v1086_v14, 0.0 }
 0x2af   : > { %v2356_v43 = vpop.permute.xlu0 %1270  ;;  %v1184_v58 = vrot.slane %v1183_v8, 4  ;;  %v1104_v16 = vsel %vm1103_vm8, %v1087_v13, 0.0  ;;  %v1227_v49 = vmul.f32 %v2303_v15, %v2315_v46  ;;  %v1180_v55 = vmul.f32 %v2317_v45, %v949_v25 }
 0x2b0   : > { %v1273_v62 = vmul.f32 %v2356_v43, %v954_v28  ;;  %v1324_v42 = vsel %vm1323_vm4, %v1320_v53, 0.0  ;;  %v1011_v28 = vrot.slane %v1010_v21, 4  ;;  %v1228_v26 = vmul.f32 %v2303_v15, %v2323_v4 }
 0x2b1   : > { %v1325_v22 = vrot.slane %v1324_v42, 4  ;;  %v1232_v50 = vadd.f32 %v1231_v11, %v1230_v63  ;;  %v1185_v41 = vadd.f32 %v1184_v58, %v1183_v8  ;;  %v1139_v17 = vrot.slane %v1138_v1, 2 }
 0x2b2   : > { %v1277_v5 = vsel %vm1276_vm15, %v1273_v62, 0.0  ;;  %v1097_v36 = vrot.slane %v1096_v34, 4  ;;  %v1105_v59 = vrot.slane %v1104_v16, 4  ;;  %v1092_v23 = vrot.slane %v1091_v0, 2 }
 0x2b3   : > { %v1278_v47 = vrot.slane %v1277_v5, 4  ;;  %v1057_v48 = vsel %vm1056_vm3, %v1040_v35, 0.0  ;;  %v2389_v27 = vadd.f32 %v1144_v24, %v1143_v33  ;;  %v2391_v32 = vadd.f32 %v1152_v31, %v1151_v2 }
 0x2b4   : > { %v1181_v46 = vmul.f32 %v2317_v45, %v2326_v20  ;;  %v1190_v30 = vsel %vm968_vm6, %v1180_v55, 0.0  ;;  %v1326_v38 = vadd.f32 %v1325_v22, %v1324_v42  ;;  %v1140_v15 = vadd.f32 %v1139_v17, %v1138_v1 }
 0x2b5   : > { %v1279_v25 = vadd.f32 %v1278_v47, %v1277_v5  ;;  %v1093_v4 = vadd.f32 %v1092_v23, %v1091_v0  ;;  %v2397_v6 = vsel %vm968_vm6, %v1227_v49, 0.0  ;;  %v2400_v44 = vsel %vm1244_vm7, %v1228_v26, 0.0 }
 0x2b6   : > { %v1233_v51 = vrot.slane %v1232_v50, 2  ;;  %v1186_v40 = vrot.slane %v1185_v41, 2  ;;  %v1098_v53 = vadd.f32 %v1097_v36, %v1096_v34  ;;  %v1106_v12 = vadd.f32 %v1105_v59, %v1104_v16 }
 0x2b7   : > { %v1141_v57 = vrot.slane %v1140_v15, 1  ;;  %v1094_v60 = vrot.slane %v1093_v4, 1  ;;  %v1191_v63 = vrot.slane %v1190_v30, 4  ;;  %vm1291_vm4 = vcmask 263168  }
 0x2b8   : > { %v1234_v45 = vadd.f32 %v1233_v51, %v1232_v50  ;;  %v1187_v20 = vadd.f32 %v1186_v40, %v1185_v41  ;;  %v1280_v8 = vrot.slane %v1279_v25, 2  ;;  %v1198_v33 = vsel %vm1197_vm1, %v1181_v46, 0.0 }
 0x2b9   : > { %v1142_v14 = vadd.f32 %v1141_v57, %v1140_v15  ;;  %v1095_v13 = vadd.f32 %v1094_v60, %v1093_v4  ;;  %v1327_v62 = vrot.slane %v1326_v38, 2  ;;  %v1004_v11 = vadd.f32 %v1003_v52, %v2366_v10 }
 0x2ba   : > { %v1235_v1 = vrot.slane %v1234_v45, 1  ;;  %v1188_v2 = vrot.slane %v1187_v20, 1  ;;  %v1281_v35 = vadd.f32 %v1280_v8, %v1279_v25  ;;  %v1012_v42 = vadd.f32 %v1011_v28, %v1010_v21 }
 0x2bb   : > { %1161 = vrot.lane.b32.xlu0 %v1142_v14, %s1772_s11  ;;  %1114 = vrot.lane.b32.xlu1 %v1095_v13, %s1773_s12  ;;  %v1328_v58 = vadd.f32 %v1327_v62, %v1326_v38  ;;  %v1058_v5 = vrot.slane %v1057_v48, 4  ;;  %v1049_v24 = vsel %vm968_vm6, %v1039_v61, 0.0  ;;  %vm1338_vm5 = vcmask 271360  }
 0x2bc   : > { %v1236_v0 = vadd.f32 %v1235_v1, %v1234_v45  ;;  %v1189_v31 = vadd.f32 %v1188_v2, %v1187_v20  ;;  %v1282_v34 = vrot.slane %v1281_v35, 1  ;;  %v1005_v16 = vrot.slane %v1004_v11, 2 }
 0x2bd   : > { %v1329_v47 = vrot.slane %v1328_v58, 1  ;;  %v1013_v49 = vrot.slane %v1012_v42, 2  ;;  %v1059_v55 = vadd.f32 %v1058_v5, %v1057_v48  ;;  %v1050_v22 = vrot.slane %v1049_v24, 4 }
 0x2be   : > { %v1199_v26 = vrot.slane %v1198_v33, 4  ;;  %v1274_v10 = vmul.f32 %v2356_v43, %v2354_v29  ;;  %v1275_v52 = vmul.f32 %v2356_v43, %v2342_v19  ;;  %v1006_v21 = vadd.f32 %v1005_v16, %v1004_v11 }
 0x2bf   : > { %1255 = vrot.lane.b32.xlu0 %v1236_v0, %s1770_s29  ;;  %1208 = vrot.lane.b32.xlu1 %v1189_v31, %s1771_s30  ;;  %v1283_v61 = vadd.f32 %v1282_v34, %v1281_v35  ;;  %v1014_v28 = vadd.f32 %v1013_v49, %v1012_v42  ;;  %v1060_v50 = vrot.slane %v1059_v55, 2  ;;  %v1051_v41 = vadd.f32 %v1050_v22, %v1049_v24 }
 0x2c0   : > { %v1238_v17 = vrot.slane %v2397_v6, 4  ;;  %v1330_v36 = vadd.f32 %v1329_v47, %v1328_v58  ;;  %v1099_v59 = vrot.slane %v1098_v53, 2  ;;  %v1107_v23 = vrot.slane %v1106_v12, 2 }
 0x2c1   : > { %v1007_v48 = vrot.slane %v1006_v21, 1  ;;  %v1015_v46 = vrot.slane %v1014_v28, 1  ;;  %v1061_v29 = vadd.f32 %v1060_v50, %v1059_v55  ;;  %v1052_v25 = vrot.slane %v1051_v41, 2 }
 0x2c2   : > { %v1246_v19 = vrot.slane %v2400_v44, 4  ;;  %v1192_v43 = vadd.f32 %v1191_v63, %v1190_v30  ;;  %v1200_v38 = vadd.f32 %v1199_v26, %v1198_v33  ;;  %v1321_v15 = vmul.f32 %v2348_v54, %v2334_v18 }
 0x2c3   : > { %v1322_v4 = vmul.f32 %v2348_v54, %v2339_v37  ;;  %v1284_v51 = vsel %vm968_vm6, %v1274_v10, 0.0  ;;  %v1292_v40 = vsel %vm1291_vm4, %v1275_v52, 0.0  ;;  %1302 = vrot.lane.b32.xlu0 %v1283_v61, %s1769_s28  ;;  %1349 = vrot.lane.b32.xlu1 %v1330_v36, %s1776_s19  ;;  %v1053_v57 = vadd.f32 %v1052_v25, %v1051_v41 }
 0x2c4   : > { %v1100_v60 = vadd.f32 %v1099_v59, %v1098_v53  ;;  %v1108_v45 = vadd.f32 %v1107_v23, %v1106_v12  ;;  %v1154_v30 = vrot.slane %v2391_v32, 2  ;;  %v1146_v63 = vrot.slane %v2389_v27, 2 }
 0x2c5   : > { %v1008_v20 = vadd.f32 %v1007_v48, %v1006_v21  ;;  %v1016_v18 = vadd.f32 %v1015_v46, %v1014_v28  ;;  %v1062_v8 = vrot.slane %v1061_v29, 1  ;;  %v1054_v33 = vrot.slane %v1053_v57, 1 }
 0x2c6   : > { %v1239_v37 = vadd.f32 %v1238_v17, %v2397_v6  ;;  %v1247_v54 = vadd.f32 %v1246_v19, %v2400_v44  ;;  %v1201_v14 = vrot.slane %v1200_v38, 2  ;;  %v1331_v13 = vsel %vm968_vm6, %v1321_v15, 0.0 }
 0x2c7   : > { %v1339_v62 = vsel %vm1338_vm5, %v1322_v4, 0.0  ;;  %v1285_v1 = vrot.slane %v1284_v51, 4  ;;  %1022 = vrot.lane.b32.xlu0 %v1008_v20, %s1775_s14  ;;  %1024 = vrot.lane.b32.xlu1 %v1016_v18, %s1775_s14  ;;  %v1293_v53 = vrot.slane %v1292_v40, 4  ;;  %v1101_v12 = vrot.slane %v1100_v60, 1  ;;  %v2447_v18 = vpop.permute.xlu1 %1364 }
 0x2c8   : > { %v1109_v2 = vrot.slane %v1108_v45, 1  ;;  %v1155_v35 = vadd.f32 %v1154_v30, %v2391_v32  ;;  %v1063_v11 = vadd.f32 %v1062_v8, %v1061_v29  ;;  %v1055_v58 = vadd.f32 %v1054_v33, %v1053_v57  ;;  %v964_v8 = vpop.permute.xlu0 %963 }
 0x2c9   : > { %v1147_v6 = vadd.f32 %v1146_v63, %v2389_v27  ;;  %v1193_v44 = vrot.slane %v1192_v43, 2  ;;  %v1240_v42 = vrot.slane %v1239_v37, 2  ;;  %v1248_v5 = vrot.slane %v1247_v54, 2 }
 0x2ca   : > { %v1332_v24 = vrot.slane %v1331_v13, 4  ;;  %v1340_v0 = vrot.slane %v1339_v62, 4  ;;  %v1202_v31 = vadd.f32 %v1201_v14, %v1200_v38  ;;  %v1286_v34 = vadd.f32 %v1285_v1, %v1284_v51 }
 0x2cb   : > { %1071 = vrot.lane.b32.xlu0 %v1063_v11, %s1774_s13  ;;  %1069 = vrot.lane.b32.xlu1 %v1055_v58, %s1774_s13  ;;  %v1294_v16 = vadd.f32 %v1293_v53, %v1292_v40  ;;  %v1102_v47 = vadd.f32 %v1101_v12, %v1100_v60  ;;  %v1110_v49 = vadd.f32 %v1109_v2, %v1108_v45  ;;  %v1156_v55 = vrot.slane %v1155_v35, 1 }
 0x2cc   : > { %v1148_v32 = vrot.slane %v1147_v6, 1  ;;  %v1194_v22 = vadd.f32 %v1193_v44, %v1192_v43  ;;  %v1241_v26 = vadd.f32 %v1240_v42, %v1239_v37  ;;  %v1249_v10 = vadd.f32 %v1248_v5, %v1247_v54 }
 0x2cd   : > { %v1333_v27 = vadd.f32 %v1332_v24, %v1331_v13  ;;  %v1341_v52 = vadd.f32 %v1340_v0, %v1339_v62  ;;  %v1287_v21 = vrot.slane %v1286_v34, 2  ;;  %v1295_v61 = vrot.slane %v1294_v16, 2 }
 0x2ce   : > { %v1157_v28 = vadd.f32 %v1156_v55, %v1155_v35  ;;  %v1149_v50 = vadd.f32 %v1148_v32, %v1147_v6  ;;  %v1195_v41 = vrot.slane %v1194_v22, 1  ;;  %v1203_v17 = vrot.slane %v1202_v31, 1 }
 0x2cf   : > { %1116 = vrot.lane.b32.xlu0 %v1102_v47, %s1773_s12  ;;  %1118 = vrot.lane.b32.xlu1 %v1110_v49, %s1773_s12  ;;  %v1334_v36 = vrot.slane %v1333_v27, 2  ;;  %v1342_v59 = vrot.slane %v1341_v52, 2  ;;  %v1288_v23 = vadd.f32 %v1287_v21, %v1286_v34  ;;  %v1296_v48 = vadd.f32 %v1295_v61, %v1294_v16 }
 0x2d0   : > { %v1196_v46 = vadd.f32 %v1195_v41, %v1194_v22  ;;  %v1204_v29 = vadd.f32 %v1203_v17, %v1202_v31  ;;  %v1250_v25 = vrot.slane %v1249_v10, 1  ;;  %v1242_v19 = vrot.slane %v1241_v26, 1 }
 0x2d1   : > { %v1335_v43 = vadd.f32 %v1334_v36, %v1333_v27  ;;  %v1343_v38 = vadd.f32 %v1342_v59, %v1341_v52  ;;  %v1297_v51 = vrot.slane %v1296_v48, 1  ;;  %v1289_v40 = vrot.slane %v1288_v23, 1 }
 0x2d2   : > { %v1251_v15 = vadd.f32 %v1250_v25, %v1249_v10  ;;  %v1243_v4 = vadd.f32 %v1242_v19, %v1241_v26  ;;  %v934_v54 = vmul.f32 %v2283_v39, %v2234_v9  ;;  %v935_v14 = vmul.f32 %v2294_v7, %v2229_v56 }
 0x2d3   : > { %1165 = vrot.lane.b32.xlu0 %v1157_v28, %s1772_s11  ;;  %1163 = vrot.lane.b32.xlu1 %v1149_v50, %s1772_s11  ;;  %v1298_v57 = vadd.f32 %v1297_v51, %v1296_v48  ;;  %v1290_v60 = vadd.f32 %v1289_v40, %v1288_v23  ;;  %v1336_v45 = vrot.slane %v1335_v43, 1  ;;  %v1344_v30 = vrot.slane %v1343_v38, 1 }
 0x2d4   : > { %v966_v13 = vmul.f32 %v964_v8, %v934_v54  ;;  %v967_v62 = vmul.f32 %v964_v8, %v935_v14  ;;  %vm2541_vm8 = vcmask 777216  }
 0x2d5   : > { %v1337_v63 = vadd.f32 %v1336_v45, %v1335_v43  ;;  %v1345_v20 = vadd.f32 %v1344_v30, %v1343_v38 }
 0x2d6   : > { %v969_v12 = vsel %vm968_vm6, %v966_v13, 0.0  ;;  %v976_v2 = vsel %vm968_vm6, %v967_v62, 0.0 }
 0x2d7   : > { %1210 = vrot.lane.b32.xlu0 %v1196_v46, %s1771_s30  ;;  %1212 = vrot.lane.b32.xlu1 %v1204_v29, %s1771_s30  ;;  %v970_v58 = vrot.slane %v969_v12, 4  ;;  %v977_v6 = vrot.slane %v976_v2, 4 }
 0x2d9   : > { %v971_v5 = vadd.f32 %v970_v58, %v969_v12  ;;  %v978_v24 = vadd.f32 %v977_v6, %v976_v2 }
 0x2db   : > { %1259 = vrot.lane.b32.xlu0 %v1251_v15, %s1770_s29  ;;  %1257 = vrot.lane.b32.xlu1 %v1243_v4, %s1770_s29  ;;  %v972_v0 = vrot.slane %v971_v5, 2  ;;  %v979_v56 = vrot.slane %v978_v24, 2 }
 0x2dd   : > { %v973_v34 = vadd.f32 %v972_v0, %v971_v5  ;;  %v980_v16 = vadd.f32 %v979_v56, %v978_v24 }
 0x2df   : > { %1306 = vrot.lane.b32.xlu0 %v1298_v57, %s1769_s28  ;;  %1304 = vrot.lane.b32.xlu1 %v1290_v60, %s1769_s28  ;;  %v974_v55 = vrot.slane %v973_v34, 1  ;;  %v981_v32 = vrot.slane %v980_v16, 1 }
 0x2e1   : > { %v975_v52 = vadd.f32 %v974_v55, %v973_v34  ;;  %v982_v21 = vadd.f32 %v981_v32, %v980_v16  ;;  %v1749_v34 = vld [vmem:[%s1859_s21 + $0x10] sm:$0xff]  ;;  %v1751_v55 = vld [vmem:[%s1859_s21 + $0x18] sm:$0xff] }
 0x2e3   : > { %1351 = vrot.lane.b32.xlu0 %v1337_v63, %s1776_s19  ;;  %1353 = vrot.lane.b32.xlu1 %v1345_v20, %s1776_s19 }
 0x31d   : > { %v1068_v33 = vpop.permute.xlu0 %1067  ;;  %v1021_v37 = vpop.permute.xlu1 %1020 }
 0x32d   : > { %v1162_v1 = vpop.permute.xlu0 %1161  ;;  %v1115_v53 = vpop.permute.xlu1 %1114 }
 0x331   : > { %v1256_v35 = vpop.permute.xlu0 %1255  ;;  %v1209_v11 = vpop.permute.xlu1 %1208 }
 0x335   : > { %v1303_v44 = vpop.permute.xlu0 %1302  ;;  %v1350_v42 = vpop.permute.xlu1 %1349 }
 0x339   : > { %v1023_v9 = vpop.permute.xlu0 %1022  ;;  %v1025_v39 = vpop.permute.xlu1 %1024 }
 0x33a   : > { %v1026_v10 = vsel %vm632_vm14, %v1021_v37, %v1023_v9  ;;  %v1027_v27 = vsel %vm632_vm14, %v1023_v9, %v1025_v39  ;;  %vm2546_vm14 = vcmask 15360  }
 0x33b   : > { %v1030_v50 = vadd.f32 %v1026_v10, %v975_v52  ;;  %v1031_v41 = vadd.f32 %v1027_v27, %v982_v21  ;;  %v1778_v52 = vmov 0.0   ;;  %vm2547_vm15 = vmmov %vm2546_vm14 }
 0x33c   : > { %1692 = vmatprep.subr.mxu1 %v1778_v52 }
 0x33d   : > { %v1072_v7 = vpop.permute.xlu0 %1071  ;;  %v1070_v31 = vpop.permute.xlu1 %1069 }
 0x33e   : > { %v1073_v61 = vsel %vm659_vm13, %v1068_v33, %v1070_v31  ;;  %v1074_v28 = vsel %vm659_vm13, %v1070_v31, %v1072_v7  ;;  %vm2545_vm13 = vcmask 130048  }
 0x33f   : > { %v1077_v48 = vadd.f32 %v1073_v61, %v1030_v50  ;;  %v1078_v46 = vadd.f32 %v1074_v28, %v1031_v41  ;;  %v1406_v50 = vld [vmem:[%s2516_s6] sm:$0x3] }
 0x340   : > { %v1482_v41 = vld [vmem:[%s2518_s8] sm:$0xff] }
 0x341   : > { %v1117_v47 = vpop.permute.xlu0 %1116  ;;  %v1119_v49 = vpop.permute.xlu1 %1118 }
 0x342   : > { %v1120_v59 = vsel %vm686_vm12, %v1115_v53, %v1117_v47  ;;  %v1121_v23 = vsel %vm686_vm12, %v1117_v47, %v1119_v49  ;;  %v1750_v47 = vld [vmem:[%s1859_s21] sm:$0xff] }
 0x343   : > { %v1124_v19 = vadd.f32 %v1120_v59, %v1077_v48  ;;  %v1125_v43 = vadd.f32 %v1121_v23, %v1078_v46  ;;  %v1483_v46 = vld [vmem:[%s2518_s8 + $0x8] sm:$0xff] }
 0x345   : > { %v1166_v22 = vpop.permute.xlu0 %1165  ;;  %v1164_v26 = vpop.permute.xlu1 %1163 }
 0x346   : > { %v1167_v29 = vsel %vm713_vm11, %v1162_v1, %v1164_v26  ;;  %v1168_v25 = vsel %vm713_vm11, %v1164_v26, %v1166_v22  ;;  %vm2542_vm11 = vmmov %vm2541_vm8  ;;  %v1752_v22 = vld [vmem:[%s1859_s21 + $0x8] sm:$0xff] }
 0x347   : > { %v1171_v40 = vadd.f32 %v1167_v29, %v1124_v19  ;;  %v1172_v57 = vadd.f32 %v1168_v25, %v1125_v43  ;;  %v1485_v29 = vld [vmem:[%s2519_s9 + $0x8] sm:$0xff]  ;;  %v1484_v19 = vld [vmem:[%s2519_s9] sm:$0xff] }
 0x349   : > { %v1211_v17 = vpop.permute.xlu0 %1210  ;;  %v1213_v36 = vpop.permute.xlu1 %1212 }
 0x34a   : > { %v1214_v4 = vsel %vm740_vm10, %v1209_v11, %v1211_v17  ;;  %v1215_v51 = vsel %vm740_vm10, %v1211_v17, %v1213_v36  ;;  %vm2543_vm10 = vcmask 769024   ;;  %v1407_v17 = vld [vmem:[%s2517_s7] sm:$0x3] }
 0x34b   : > { %v1218_v30 = vadd.f32 %v1214_v4, %v1171_v40  ;;  %v1219_v63 = vadd.f32 %v1215_v51, %v1172_v57  ;;  %vm2544_vm12 = vmmov %vm2543_vm10 }
 0x34d   : > { %v1260_v38 = vpop.permute.xlu0 %1259  ;;  %v1258_v15 = vpop.permute.xlu1 %1257 }
 0x34e   : > { %v1261_v60 = vsel %vm767_vm9, %v1256_v35, %v1258_v15  ;;  %v1262_v45 = vsel %vm767_vm9, %v1258_v15, %v1260_v38  ;;  %v1370_v35 = vrot.slane %v2447_v18, %v1849_v3  ;;  %vm1779_vm9 = vmmov 0  }
 0x34f   : > { %v1265_v54 = vadd.f32 %v1261_v60, %v1218_v30  ;;  %v1266_v14 = vadd.f32 %v1262_v45, %v1219_v63  ;;  %1696 = vmatprep.mubr.msk.f32.mxu1 %vm1779_vm9, %v1778_v52 }
 0x351   : > { %v1307_v20 = vpop.permute.xlu0 %1306  ;;  %v1305_v8 = vpop.permute.xlu1 %1304 }
 0x352   : > { %v1308_v33 = vsel %vm2541_vm8, %v1303_v44, %v1305_v8  ;;  %v1309_v37 = vsel %vm2542_vm11, %v1305_v8, %v1307_v20 }
 0x353   : > { %v1312_v13 = vadd.f32 %v1308_v33, %v1265_v54  ;;  %v1313_v62 = vadd.f32 %v1309_v37, %v1266_v14 }
 0x355   : > { %v1352_v1 = vpop.permute.xlu0 %1351  ;;  %v1354_v53 = vpop.permute.xlu1 %1353 }
 0x356   : > { %v1355_v12 = vsel %vm2543_vm10, %v1350_v42, %v1352_v1  ;;  %v1356_v2 = vsel %vm2544_vm12, %v1352_v1, %v1354_v53 }
 0x357   : > { %v1359_v11 = vadd.f32 %v1355_v12, %v1312_v13  ;;  %v1360_v58 = vadd.f32 %v1356_v2, %v1313_v62 }
 0x359   : > { %v1371_v6 = vadd.f32 %v1370_v35, %v1359_v11  ;;  %v1372_v44 = vadd.f32 %v1370_v35, %v1360_v58 }
 0x35b   : > { %v1674_v5 = vmul.f32 -1.442695, %v1371_v6  ;;  %v1675_v24 = vmul.f32 -1.442695, %v1372_v44 }
 0x35d   : > { %1733 = vpow2.f32 %v1674_v5 }
 0x35e   : > { %1735 = vpow2.f32 %v1675_v24 }
 0x36a   : > { %v1734_v9 = vpop.eup %1733 }
 0x36b   : > { %v1736_v39 = vpop.eup %1735  ;;  %v1379_v42 = vadd.f32 1.0, %v1734_v9 }
 0x36c   : > { %v1380_v0 = vadd.f32 1.0, %v1736_v39 }
 0x36d   : > { %1737 = vrcp.f32 %v1379_v42 }
 0x36e   : > { %1739 = vrcp.f32 %v1380_v0 }
 0x37a   : > { %v1738_v56 = vpop.eup %1737 }
 0x37b   : > { %v1740_v18 = vpop.eup %1739  ;;  %v1388_v7 = vrot.slane %v1738_v56, %v1849_v3 }
 0x37c   : > { %v1392_v31 = vrot.slane %v1740_v18, %v1849_v3 }
 0x37d   : > { %v1395_v16 = vmul.f32 %v1749_v34, %v1388_v7  ;;  %v1393_v49 = vmul.f32 %v1750_v47, %v1388_v7 }
 0x37e   : > { %v1396_v32 = vmul.f32 %v1751_v55, %v1392_v31  ;;  %v1394_v26 = vmul.f32 %v1752_v22, %v1392_v31 }
 0x380   : > { %v1400_v10 = vadd.f32 %v1396_v32, %v1395_v16  ;;  %v1397_v27 = vadd.f32 %v1394_v26, %v1393_v49 }
 0x382   : > { %1401 = vadd.xlane.f32.xlu0 %v1400_v10  ;;  %1398 = vadd.xlane.f32.xlu1 %v1397_v27 }
 0x40b   : > { %v1402_v21 = vpop.xlane.xlu0 %1401  ;;  %v1399_v61 = vpop.xlane.xlu1 %1398 }
 0x40c   : > { %v1405_v28 = vmul.f32 0.00390625, %v1402_v21  ;;  %v1404_v3 = vmul.f32 0.00390625, %v1399_v61 }
 0x40e   : > { %1693 = vmatpush3.msra.mxu1 %v1405_v28 }
 0x40f   : > { %1694 = vmatprep.subr.mxu1 %v1778_v52 }
 0x410   : > { %1695 = vmatpush3.msra.mxu1 %v1404_v3 }
 0x411   : > { %1697 = vmatmul.mubr.msk.f32.vlgmr.msra.gmra.mxu1 %vm2545_vm13, %v1406_v50 }
 0x412   : > { %1701 = vmatprep.mubr.msk.f32.mxu1 %vm2546_vm14, %v1482_v41 }
 0x4d1   : > { %v1477_v36 = vpop.f32.mrf.mxu1 }
 0x4d2   : > { %v1478_v59 = vadd.f32 %v1477_v36, %v1407_v17 }
 0x4d3   : > { %v1698_v23 = vpop.f32.mrf.mxu1 }
 0x4d4   : > { %v1481_v48 = vmax.f32 %v1478_v59, 0.0 }
 0x4d6   : > { %1699 = vmatprep.subr.msk.mxu1 %vm968_vm6, %v1481_v48 }
 0x4d7   : > { %1700 = vmatpush3.msk.msra.mxu1 %vm968_vm6, %v1481_v48 }
 0x4d8   : > { %1702 = vmatmul.mubr.msk.f32.vlgmr.msra.gmra.mxu1 %vm2547_vm15, %v1483_v46 }
 0x598   : > { %v1703_v25 = vpop.f32.mrf.mxu1 }
 0x599   : > { %v1567_v43 = vadd.f32 %v1703_v25, %v1485_v29 }
 0x59a   : > { %v1561_v38 = vpop.f32.mrf.mxu1 }
 0x59b   : > { %v1681_v15 = vmul.f32 -1.442695, %v1567_v43  ;;  %v1562_v4 = vadd.f32 %v1561_v38, %v1484_v19 }
 0x59d   : > { %1741 = vpow2.f32 %v1681_v15  ;;  %v1680_v51 = vmul.f32 -1.442695, %v1562_v4 }
 0x59f   : > { %1743 = vpow2.f32 %v1680_v51 }
 0x5aa   : > { %v1742_v40 = vpop.eup %1741 }
 0x5ab   : > { %v1577_v57 = vadd.f32 1.0, %v1742_v40 }
 0x5ac   : > { %v1744_v60 = vpop.eup %1743 }
 0x5ad   : > { %1745 = vrcp.f32 %v1577_v57  ;;  %v1576_v45 = vadd.f32 1.0, %v1744_v60 }
 0x5af   : > { %1747 = vrcp.f32 %v1576_v45 }
 0x5ba   : > { %v1746_v30 = vpop.eup %1745 }
 0x5bb   : > { %1589 = vperm.xlu1 %1732, %v1746_v30  }
 0x5bc   : > { %v1748_v63 = vpop.eup %1747 }
 0x5bd   : > { %1584 = vperm.xlu0 %1731, %v1748_v63  }
 0x636   : > { %v1590_v20 = vpop.permute.xlu1 %1589 }
 0x637   : > { %v1594_v8 = vmul.f32 %v1590_v20, %v1395_v16  ;;  %v1595_v33 = vmul.f32 %v1590_v20, %v1396_v32 }
 0x638   : > { %v1585_v37 = vpop.permute.xlu0 %1584 }
 0x639   : > { %1598 = vst [vmem:[%s361_s22 + $0x10] sm:$0xff] %v1594_v8  ;;  %1599 = vst [vmem:[%s361_s22 + $0x18] sm:$0xff] %v1595_v33  ;;  %v1592_v54 = vmul.f32 %v1585_v37, %v1393_v49  ;;  %v1593_v14 = vmul.f32 %v1585_v37, %v1394_v26 }
 0x63b   : > { %1596 = vst [vmem:[%s361_s22] sm:$0xff] %v1592_v54  ;;  %1597 = vst [vmem:[%s361_s22 + $0x8] sm:$0xff] %v1593_v14 }
 0x63c PF: > { %s22_s15 = sadd.s32 1, %s1759_s15  }
 0x63d   : > { %p19_p4 = scmp.ge.s32.totalorder %s22_s15, 4  }
 0x63f   :  { %21 = sbr.rel (!%p19_p4) target bundleno = 3 (0x3), region = 98 }

</bundles_post_ra>
